<compile_context>
chip_gen: v6e
topology: v6e:2x2x1
jax: 0.10.0
libtpu: 0.0.40
codegen_flags: <defaults>
</compile_context>

<pallas_src>
import functools

import jax
import jax.numpy as jnp
import numpy as np
from jax.experimental import pallas as pl
from jax.experimental.pallas import tpu as pltpu

BN_EPS = 1e-5
H64 = 64          # hidden width hard-coded inside forward_net / inverse_net
LANES = 128       # lane width of the packed slabs


# --------------------------------------------------------------------------
# Parameter construction (PyTorch-default-like init).
# --------------------------------------------------------------------------

def init_params(key, input_size, latent_dim, hidden_dim, forward_dim):
    p = {}

    def nk():
        nonlocal key
        key, sub = jax.random.split(key)
        return sub

    def add_linear(name, fan_in, fan_out):
        bound = 1.0 / float(fan_in) ** 0.5
        p[name + "_w"] = jax.random.uniform(nk(), (fan_in, fan_out), jnp.float32,
                                            -bound, bound)
        p[name + "_b"] = jax.random.uniform(nk(), (1, fan_out), jnp.float32,
                                            -bound, bound)

    def add_bn(name, fan):
        p[name + "_g"] = jnp.ones((1, fan), jnp.float32)
        p[name + "_b"] = jnp.zeros((1, fan), jnp.float32)

    # forward_net: Lin(fd,64) ReLU BN, Lin(64,64) ReLU BN, Lin(64,64) ReLU, Lin(64,in)
    add_linear("fw1", forward_dim, H64); add_bn("fw_bn1", H64)
    add_linear("fw2", H64, H64);         add_bn("fw_bn2", H64)
    add_linear("fw3", H64, H64)
    add_linear("fw4", H64, input_size)
    # inverse_net: Lin(in,64) ReLU BN, Lin(64,64) ReLU BN, Lin(64,64) ReLU, Lin(64,fd)
    add_linear("inv1", input_size, H64); add_bn("inv_bn1", H64)
    add_linear("inv2", H64, H64);        add_bn("inv_bn2", H64)
    add_linear("inv3", H64, H64)
    add_linear("inv4", H64, forward_dim)
    # encoder: Lin(in+fd,H) ReLU BN, Lin(H,H) ReLU
    add_linear("enc1", input_size + forward_dim, hidden_dim); add_bn("enc_bn1", hidden_dim)
    add_linear("enc2", hidden_dim, hidden_dim)
    # heads
    add_linear("mu", hidden_dim, latent_dim)
    add_linear("lv", hidden_dim, latent_dim)
    # decoder: Lin(ld+fd,H) ReLU BN, Lin(H,H) ReLU BN, Lin(H,in)
    add_linear("dec1", latent_dim + forward_dim, hidden_dim); add_bn("dec_bn1", hidden_dim)
    add_linear("dec2", hidden_dim, hidden_dim);               add_bn("dec_bn2", hidden_dim)
    add_linear("dec3", hidden_dim, input_size)
    return p


# --------------------------------------------------------------------------
# Host-side packing: bf16 weight slab + f32 bias/BN vector slab.
# --------------------------------------------------------------------------

_MAT_ORDER = ["fw1", "fw2", "fw3", "fw4",
              "inv1", "inv2", "inv3", "inv4",
              "enc1x", "enc1y", "enc2", "head",
              "dec1z", "dec1y", "dec2", "dec3"]

_VEC_ORDER = ["fw1_b", "fw_bn1_g", "fw_bn1_b", "fw2_b", "fw_bn2_g", "fw_bn2_b",
              "fw3_b", "fw4_b",
              "inv1_b", "inv_bn1_g", "inv_bn1_b", "inv2_b", "inv_bn2_g", "inv_bn2_b",
              "inv3_b", "inv4_b",
              "enc1_b", "enc_bn1_g", "enc_bn1_b", "enc2_b",
              "head_b",
              "dec1_b", "dec_bn1_g", "dec_bn1_b", "dec2_b", "dec_bn2_g", "dec_bn2_b",
              "dec3_b"]


def pack_params(p, input_size, latent_dim):
    """Returns (w_slab bf16, v_slab f32, w_off, v_off).

    w_off[name] = (row_offset, rows, cols); row offsets 8-aligned, lane offset 0.
    v_off[name] = (row, cols); one row per bias / BN-affine param.
    """
    mats = {
        "fw1": p["fw1_w"], "fw2": p["fw2_w"], "fw3": p["fw3_w"], "fw4": p["fw4_w"],
        "inv1": p["inv1_w"], "inv2": p["inv2_w"], "inv3": p["inv3_w"], "inv4": p["inv4_w"],
        # encoder first layer split along K:  cat(x, y) @ W == x@Wx + y@Wy
        "enc1x": p["enc1_w"][:input_size, :], "enc1y": p["enc1_w"][input_size:, :],
        "enc2": p["enc2_w"],
        # fused mu|logvar head (same input -> valid N-fusion)
        "head": jnp.concatenate([p["mu_w"], p["lv_w"]], axis=1),
        # decoder first layer split along K:  cat(z, y) @ W == z@Wz + y@Wy
        "dec1z": p["dec1_w"][:latent_dim, :], "dec1y": p["dec1_w"][latent_dim:, :],
        "dec2": p["dec2_w"], "dec3": p["dec3_w"],
    }
    vecs = {name: p[name] for name in _VEC_ORDER if name != "head_b"}
    vecs["head_b"] = jnp.concatenate([p["mu_b"], p["lv_b"]], axis=1)

    # weight slab (bf16): halves the exposed param DMA and feeds the MXU directly
    w_off, row = {}, 0
    for name in _MAT_ORDER:
        r, c = mats[name].shape
        assert c <= LANES
        w_off[name] = (row, r, c)
        row += -(-r // 8) * 8                      # 8-sublane-aligned rows
    w_np = np.zeros((row, LANES), np.float32)
    for name in _MAT_ORDER:
        off, r, c = w_off[name]
        w_np[off:off + r, :c] = np.asarray(mats[name])
    w_slab = jnp.asarray(w_np).astype(jnp.bfloat16)

    # vector slab (f32): one row per bias / gamma / beta, no padding blow-up
    v_off = {}
    n_rows = -(-len(_VEC_ORDER) // 8) * 8
    v_np = np.zeros((n_rows, LANES), np.float32)
    for i, name in enumerate(_VEC_ORDER):
        c = vecs[name].shape[1]
        v_off[name] = (i, c)
        v_np[i, :c] = np.asarray(vecs[name]).reshape(-1)
    v_slab = jnp.asarray(v_np)
    return w_slab, v_slab, w_off, v_off


# --------------------------------------------------------------------------
# Pallas kernel: whole forward pass, gridless, everything resident in VMEM.
# --------------------------------------------------------------------------

def _cvae_tandem_kernel(w_off, v_off, dims, inv_batch,
                        x_ref, y_ref, eps_ref, w_ref, v_ref, out_ref):
    IN, FD, LD = dims
    bf16 = jnp.bfloat16

    def W(name):                                    # lazy static slice, bf16
        r0, r, c = w_off[name]
        return w_ref[r0:r0 + r, 0:c]

    def V(name):                                    # (1, c) f32 bias / BN row
        i, c = v_off[name]
        return v_ref[i:i + 1, 0:c]

    relu = lambda h: jnp.maximum(h, 0.0)

    def lin(h, name):                               # single-pass bf16 MXU, f32 acc
        return jnp.dot(h.astype(bf16), W(name),
                       preferred_element_type=jnp.float32) + V(name + "_b")

    def bn(h, name):                                # train-mode BatchNorm1d
        # independent sum / sum-of-squares -> the two XLU reduces can overlap
        s1 = jnp.sum(h, axis=0, keepdims=True)
        s2 = jnp.sum(h * h, axis=0, keepdims=True)
        mean = s1 * inv_batch
        var = s2 * inv_batch - mean * mean
        return (h - mean) * jax.lax.rsqrt(var + BN_EPS) * V(name + "_g") + V(name + "_b")

    x = x_ref[...]
    y = y_ref[...]
    eps = eps_ref[...]
    yb = y.astype(bf16)

    # ---- forward_net(y) -> x_pred ----
    h = relu(lin(y, "fw1"));  h = bn(h, "fw_bn1")
    h = relu(lin(h, "fw2"));  h = bn(h, "fw_bn2")
    h = relu(lin(h, "fw3"))                         # sequential with fw4: no N-fusion
    x_pred = lin(h, "fw4")

    # ---- inverse_net(x_pred) -> y_pred ----
    h = relu(lin(x_pred, "inv1")); h = bn(h, "inv_bn1")
    h = relu(lin(h, "inv2"));      h = bn(h, "inv_bn2")
    h = relu(lin(h, "inv3"))
    y_pred = lin(h, "inv4")

    # ---- encoder(cat(x, y)) via split-K (no concat needed) ----
    h = relu(jnp.dot(x.astype(bf16), W("enc1x"), preferred_element_type=jnp.float32)
             + jnp.dot(yb, W("enc1y"), preferred_element_type=jnp.float32)
             + V("enc1_b"))
    h = bn(h, "enc_bn1")
    h = relu(lin(h, "enc2"))

    # ---- fused mu|logvar head (single MXU push) ----
    ml = lin(h, "head")                             # lanes [0:LD)=mu, [LD:2LD)=logvar
    mu = ml[:, 0:LD]
    logvar = ml[:, LD:2 * LD]

    # ---- reparameterize (f32 VPU/EUP) ----
    z = mu + eps * jnp.exp(0.5 * logvar)

    # ---- decoder(cat(z, y)) via split-K; tiny y-branch is off the z path ----
    h = relu(jnp.dot(z.astype(bf16), W("dec1z"), preferred_element_type=jnp.float32)
             + jnp.dot(yb, W("dec1y"), preferred_element_type=jnp.float32)
             + V("dec1_b"))
    h = bn(h, "dec_bn1")
    h = relu(lin(h, "dec2")); h = bn(h, "dec_bn2")
    recon = lin(h, "dec3")

    # ---- single lane-dense packed output: one unmasked full-width store ----
    pad = LANES - (2 * IN + 2 * LD + FD)
    packed = jnp.concatenate(
        [recon, ml, x_pred, y_pred,
         jnp.zeros((recon.shape[0], pad), jnp.float32)], axis=1)
    out_ref[...] = packed


def build_forward(w_off, v_off, dims, batch):
    """Returns jitted forward(x, y, eps, w_slab, v_slab) -> (recon, mu, logvar, x_pred, y_pred)."""
    IN, FD, LD = dims
    kernel = functools.partial(_cvae_tandem_kernel, w_off, v_off, dims, 1.0 / batch)
    vmem = pl.BlockSpec(memory_space=pltpu.MemorySpace.VMEM)
    call = pl.pallas_call(
        kernel,
        out_shape=jax.ShapeDtypeStruct((batch, LANES), jnp.float32),
        in_specs=[vmem] * 5,
        out_specs=vmem,
    )

    @jax.jit
    def forward(x, y, eps, w_slab, v_slab):
        out = call(x, y, eps, w_slab, v_slab)       # no wrapper-side concatenate
        recon = out[:, 0:IN]
        mu = out[:, IN:IN + LD]
        logvar = out[:, IN + LD:IN + 2 * LD]
        x_pred = out[:, IN + 2 * LD:2 * IN + 2 * LD]
        y_pred = out[:, 2 * IN + 2 * LD:2 * IN + 2 * LD + FD]
        return recon, mu, logvar, x_pred, y_pred

    return forward


# --------------------------------------------------------------------------
# References for correctness checking.
# --------------------------------------------------------------------------

def forward_ref_f32(x, y, eps, p):
    """Pure-f32 reference with the original BN formulation (PyTorch semantics)."""
    relu = lambda h: jnp.maximum(h, 0.0)
    lin = lambda h, n: jnp.dot(h, p[n + "_w"]) + p[n + "_b"]

    def bn(h, n):
        mean = jnp.mean(h, axis=0, keepdims=True)
        var = jnp.mean((h - mean) ** 2, axis=0, keepdims=True)
        return (h - mean) * jax.lax.rsqrt(var + BN_EPS) * p[n + "_g"] + p[n + "_b"]

    return _ref_body(x, y, eps, p, lin, bn)


def forward_ref_matched(x, y, eps, p):
    """Reference matching the kernel's arithmetic (bf16 MXU operands, E[h^2]-m^2 var)."""
    bf16 = jnp.bfloat16

    def lin(h, n):
        return jnp.dot(h.astype(bf16), p[n + "_w"].astype(bf16),
                       preferred_element_type=jnp.float32) + p[n + "_b"]

    def bn(h, n):
        s1 = jnp.sum(h, axis=0, keepdims=True)
        s2 = jnp.sum(h * h, axis=0, keepdims=True)
        mean = s1 / h.shape[0]
        var = s2 / h.shape[0] - mean * mean
        return (h - mean) * jax.lax.rsqrt(var + BN_EPS) * p[n + "_g"] + p[n + "_b"]

    return _ref_body(x, y, eps, p, lin, bn)


def _ref_body(x, y, eps, p, lin, bn):
    relu = lambda h: jnp.maximum(h, 0.0)

    h = relu(lin(y, "fw1"));  h = bn(h, "fw_bn1")
    h = relu(lin(h, "fw2"));  h = bn(h, "fw_bn2")
    h = relu(lin(h, "fw3"))
    x_pred = lin(h, "fw4")

    h = relu(lin(x_pred, "inv1")); h = bn(h, "inv_bn1")
    h = relu(lin(h, "inv2"));      h = bn(h, "inv_bn2")
    h = relu(lin(h, "inv3"))
    y_pred = lin(h, "inv4")

    h = relu(lin(jnp.concatenate([x, y], axis=1), "enc1")); h = bn(h, "enc_bn1")
    h = relu(lin(h, "enc2"))

    mu = lin(h, "mu")
    logvar = lin(h, "lv")
    z = mu + eps * jnp.exp(0.5 * logvar)

    h = relu(lin(jnp.concatenate([z, y], axis=1), "dec1")); h = bn(h, "dec_bn1")
    h = relu(lin(h, "dec2")); h = bn(h, "dec_bn2")
    recon = lin(h, "dec3")
    return recon, mu, logvar, x_pred, y_pred


# --------------------------------------------------------------------------

if __name__ == "__main__":
    INPUT_SIZE = 16
    LATENT_DIM = 8
    HIDDEN_DIM = 32
    FORWARD_DIM = 3
    BATCH = 8

    root = jax.random.PRNGKey(0)
    k_params, k_x, k_y, k_eps = jax.random.split(root, 4)

    params = init_params(k_params, INPUT_SIZE, LATENT_DIM, HIDDEN_DIM, FORWARD_DIM)
    w_slab, v_slab, w_off, v_off = pack_params(params, INPUT_SIZE, LATENT_DIM)

    x = jax.random.normal(k_x, (BATCH, INPUT_SIZE), jnp.float32)
    y = jax.random.normal(k_y, (BATCH, FORWARD_DIM), jnp.float32)
    eps = jax.random.normal(k_eps, (BATCH, LATENT_DIM), jnp.float32)  # torch.randn_like(std)

    forward = build_forward(w_off, v_off, (INPUT_SIZE, FORWARD_DIM, LATENT_DIM), BATCH)
    outs = jax.block_until_ready(forward(x, y, eps, w_slab, v_slab))
    recon, mu, logvar, x_pred, y_pred = outs

    # Tight check: kernel vs a reference using identical arithmetic (bf16 MXU).
    refs_m = forward_ref_matched(x, y, eps, params)
    for got, want in zip(outs, refs_m):
        np.testing.assert_allclose(np.asarray(got), np.asarray(want),
                                   rtol=5e-3, atol=5e-3)

    # Sanity check: kernel vs the full-f32 PyTorch-semantics reference
    # (loose tolerance accounts for single-pass bf16 MXU operands).
    refs_f = forward_ref_f32(x, y, eps, params)
    for got, want in zip(outs, refs_f):
        np.testing.assert_allclose(np.asarray(got), np.asarray(want),
                                   rtol=1e-1, atol=5e-2)

    assert recon.shape == (BATCH, INPUT_SIZE)
    assert mu.shape == (BATCH, LATENT_DIM)
    assert logvar.shape == (BATCH, LATENT_DIM)
    assert x_pred.shape == (BATCH, INPUT_SIZE)
    assert y_pred.shape == (BATCH, FORWARD_DIM)

    print("KERNEL_OK")
</pallas_src>

<mosaic_0001>
module attributes {stable_mosaic.version = 11 : i64} {
  func.func @_cvae_tandem_kernel(%arg0: memref<8x16xf32, #tpu.memory_space<vmem>>, %arg1: memref<8x3xf32, #tpu.memory_space<vmem>>, %arg2: memref<8x8xf32, #tpu.memory_space<vmem>>, %arg3: memref<576x128xbf16, #tpu.memory_space<vmem>>, %arg4: memref<32x128xf32, #tpu.memory_space<vmem>>, %arg5: memref<8x128xf32, #tpu.memory_space<vmem>>) attributes {dimension_semantics = [], scalar_prefetch = 0 : i64, scratch_operands = 0 : i64, tpu.core_type = #tpu.core_type<tc>} {
    %c0 = arith.constant 0 : index
    %c0_0 = arith.constant 0 : index
    %0 = vector.load %arg0[%c0, %c0_0] : memref<8x16xf32, #tpu.memory_space<vmem>>, vector<8x16xf32>
    %c0_1 = arith.constant 0 : index
    %c0_2 = arith.constant 0 : index
    %1 = vector.load %arg1[%c0_1, %c0_2] : memref<8x3xf32, #tpu.memory_space<vmem>>, vector<8x3xf32>
    %c0_3 = arith.constant 0 : index
    %c0_4 = arith.constant 0 : index
    %2 = vector.load %arg2[%c0_3, %c0_4] : memref<8x8xf32, #tpu.memory_space<vmem>>, vector<8x8xf32>
    %3 = arith.truncf %1 : vector<8x3xf32> to vector<8x3xbf16>
    %4 = arith.truncf %1 : vector<8x3xf32> to vector<8x3xbf16>
    %c0_5 = arith.constant 0 : index
    %c0_6 = arith.constant 0 : index
    %5 = vector.load %arg3[%c0_5, %c0_6] : memref<576x128xbf16, #tpu.memory_space<vmem>>, vector<3x64xbf16>
    %cst = arith.constant dense<0.000000e+00> : vector<8x64xf32>
    %6 = tpu.matmul %4, %5, %cst {dimension_numbers = #tpu.dot_dimension_numbers<[1], [0], [0], [1], [0, 0, 1, 1], [], []>} : vector<8x3xbf16>, vector<3x64xbf16>, vector<8x64xf32> -> vector<8x64xf32>
    %c0_7 = arith.constant 0 : index
    %c0_8 = arith.constant 0 : index
    %7 = vector.load %arg4[%c0_7, %c0_8] : memref<32x128xf32, #tpu.memory_space<vmem>>, vector<1x64xf32>
    %8 = vector.broadcast %7 : vector<1x64xf32> to vector<8x64xf32>
    %9 = arith.addf %6, %8 : vector<8x64xf32>
    %cst_9 = arith.constant 0.000000e+00 : f32
    %10 = vector.broadcast %cst_9 : f32 to vector<8x64xf32>
    %11 = arith.maximumf %9, %10 : vector<8x64xf32>
    %cst_10 = arith.constant dense<0.000000e+00> : vector<64xf32>
    %12 = vector.multi_reduction <add>, %11, %cst_10 [0] : vector<8x64xf32> to vector<64xf32>
    %13 = vector.shape_cast %12 : vector<64xf32> to vector<1x64xf32>
    %14 = arith.mulf %11, %11 : vector<8x64xf32>
    %cst_11 = arith.constant dense<0.000000e+00> : vector<64xf32>
    %15 = vector.multi_reduction <add>, %14, %cst_11 [0] : vector<8x64xf32> to vector<64xf32>
    %16 = vector.shape_cast %15 : vector<64xf32> to vector<1x64xf32>
    %cst_12 = arith.constant 1.250000e-01 : f32
    %17 = vector.broadcast %cst_12 : f32 to vector<1x64xf32>
    %18 = arith.mulf %13, %17 : vector<1x64xf32>
    %cst_13 = arith.constant 1.250000e-01 : f32
    %19 = vector.broadcast %cst_13 : f32 to vector<1x64xf32>
    %20 = arith.mulf %16, %19 : vector<1x64xf32>
    %21 = arith.mulf %18, %18 : vector<1x64xf32>
    %22 = arith.subf %20, %21 : vector<1x64xf32>
    %23 = vector.broadcast %18 : vector<1x64xf32> to vector<8x64xf32>
    %24 = arith.subf %11, %23 : vector<8x64xf32>
    %cst_14 = arith.constant 9.99999974E-6 : f32
    %25 = vector.broadcast %cst_14 : f32 to vector<1x64xf32>
    %26 = arith.addf %22, %25 : vector<1x64xf32>
    %27 = math.rsqrt %26 : vector<1x64xf32>
    %28 = vector.broadcast %27 : vector<1x64xf32> to vector<8x64xf32>
    %29 = arith.mulf %24, %28 : vector<8x64xf32>
    %c1 = arith.constant 1 : index
    %c0_15 = arith.constant 0 : index
    %30 = vector.load %arg4[%c1, %c0_15] : memref<32x128xf32, #tpu.memory_space<vmem>>, vector<1x64xf32>
    %31 = vector.broadcast %30 : vector<1x64xf32> to vector<8x64xf32>
    %32 = arith.mulf %29, %31 : vector<8x64xf32>
    %c2 = arith.constant 2 : index
    %c0_16 = arith.constant 0 : index
    %33 = vector.load %arg4[%c2, %c0_16] : memref<32x128xf32, #tpu.memory_space<vmem>>, vector<1x64xf32>
    %34 = vector.broadcast %33 : vector<1x64xf32> to vector<8x64xf32>
    %35 = arith.addf %32, %34 : vector<8x64xf32>
    %36 = arith.truncf %35 : vector<8x64xf32> to vector<8x64xbf16>
    %c8 = arith.constant 8 : index
    %c0_17 = arith.constant 0 : index
    %37 = vector.load %arg3[%c8, %c0_17] : memref<576x128xbf16, #tpu.memory_space<vmem>>, vector<64x64xbf16>
    %cst_18 = arith.constant dense<0.000000e+00> : vector<8x64xf32>
    %38 = tpu.matmul %36, %37, %cst_18 {dimension_numbers = #tpu.dot_dimension_numbers<[1], [0], [0], [1], [0, 0, 1, 1], [], []>} : vector<8x64xbf16>, vector<64x64xbf16>, vector<8x64xf32> -> vector<8x64xf32>
    %c3 = arith.constant 3 : index
    %c0_19 = arith.constant 0 : index
    %39 = vector.load %arg4[%c3, %c0_19] : memref<32x128xf32, #tpu.memory_space<vmem>>, vector<1x64xf32>
    %40 = vector.broadcast %39 : vector<1x64xf32> to vector<8x64xf32>
    %41 = arith.addf %38, %40 : vector<8x64xf32>
    %cst_20 = arith.constant 0.000000e+00 : f32
    %42 = vector.broadcast %cst_20 : f32 to vector<8x64xf32>
    %43 = arith.maximumf %41, %42 : vector<8x64xf32>
    %cst_21 = arith.constant dense<0.000000e+00> : vector<64xf32>
    %44 = vector.multi_reduction <add>, %43, %cst_21 [0] : vector<8x64xf32> to vector<64xf32>
    %45 = vector.shape_cast %44 : vector<64xf32> to vector<1x64xf32>
    %46 = arith.mulf %43, %43 : vector<8x64xf32>
    %cst_22 = arith.constant dense<0.000000e+00> : vector<64xf32>
    %47 = vector.multi_reduction <add>, %46, %cst_22 [0] : vector<8x64xf32> to vector<64xf32>
    %48 = vector.shape_cast %47 : vector<64xf32> to vector<1x64xf32>
    %cst_23 = arith.constant 1.250000e-01 : f32
    %49 = vector.broadcast %cst_23 : f32 to vector<1x64xf32>
    %50 = arith.mulf %45, %49 : vector<1x64xf32>
    %cst_24 = arith.constant 1.250000e-01 : f32
    %51 = vector.broadcast %cst_24 : f32 to vector<1x64xf32>
    %52 = arith.mulf %48, %51 : vector<1x64xf32>
    %53 = arith.mulf %50, %50 : vector<1x64xf32>
    %54 = arith.subf %52, %53 : vector<1x64xf32>
    %55 = vector.broadcast %50 : vector<1x64xf32> to vector<8x64xf32>
    %56 = arith.subf %43, %55 : vector<8x64xf32>
    %cst_25 = arith.constant 9.99999974E-6 : f32
    %57 = vector.broadcast %cst_25 : f32 to vector<1x64xf32>
    %58 = arith.addf %54, %57 : vector<1x64xf32>
    %59 = math.rsqrt %58 : vector<1x64xf32>
    %60 = vector.broadcast %59 : vector<1x64xf32> to vector<8x64xf32>
    %61 = arith.mulf %56, %60 : vector<8x64xf32>
    %c4 = arith.constant 4 : index
    %c0_26 = arith.constant 0 : index
    %62 = vector.load %arg4[%c4, %c0_26] : memref<32x128xf32, #tpu.memory_space<vmem>>, vector<1x64xf32>
    %63 = vector.broadcast %62 : vector<1x64xf32> to vector<8x64xf32>
    %64 = arith.mulf %61, %63 : vector<8x64xf32>
    %c5 = arith.constant 5 : index
    %c0_27 = arith.constant 0 : index
    %65 = vector.load %arg4[%c5, %c0_27] : memref<32x128xf32, #tpu.memory_space<vmem>>, vector<1x64xf32>
    %66 = vector.broadcast %65 : vector<1x64xf32> to vector<8x64xf32>
    %67 = arith.addf %64, %66 : vector<8x64xf32>
    %68 = arith.truncf %67 : vector<8x64xf32> to vector<8x64xbf16>
    %c72 = arith.constant 72 : index
    %c0_28 = arith.constant 0 : index
    %69 = vector.load %arg3[%c72, %c0_28] : memref<576x128xbf16, #tpu.memory_space<vmem>>, vector<64x64xbf16>
    %cst_29 = arith.constant dense<0.000000e+00> : vector<8x64xf32>
    %70 = tpu.matmul %68, %69, %cst_29 {dimension_numbers = #tpu.dot_dimension_numbers<[1], [0], [0], [1], [0, 0, 1, 1], [], []>} : vector<8x64xbf16>, vector<64x64xbf16>, vector<8x64xf32> -> vector<8x64xf32>
    %c6 = arith.constant 6 : index
    %c0_30 = arith.constant 0 : index
    %71 = vector.load %arg4[%c6, %c0_30] : memref<32x128xf32, #tpu.memory_space<vmem>>, vector<1x64xf32>
    %72 = vector.broadcast %71 : vector<1x64xf32> to vector<8x64xf32>
    %73 = arith.addf %70, %72 : vector<8x64xf32>
    %cst_31 = arith.constant 0.000000e+00 : f32
    %74 = vector.broadcast %cst_31 : f32 to vector<8x64xf32>
    %75 = arith.maximumf %73, %74 : vector<8x64xf32>
    %76 = arith.truncf %75 : vector<8x64xf32> to vector<8x64xbf16>
    %c136 = arith.constant 136 : index
    %c0_32 = arith.constant 0 : index
    %77 = vector.load %arg3[%c136, %c0_32] : memref<576x128xbf16, #tpu.memory_space<vmem>>, vector<64x16xbf16>
    %cst_33 = arith.constant dense<0.000000e+00> : vector<8x16xf32>
    %78 = tpu.matmul %76, %77, %cst_33 {dimension_numbers = #tpu.dot_dimension_numbers<[1], [0], [0], [1], [0, 0, 1, 1], [], []>} : vector<8x64xbf16>, vector<64x16xbf16>, vector<8x16xf32> -> vector<8x16xf32>
    %c7 = arith.constant 7 : index
    %c0_34 = arith.constant 0 : index
    %79 = vector.load %arg4[%c7, %c0_34] : memref<32x128xf32, #tpu.memory_space<vmem>>, vector<1x16xf32>
    %80 = vector.broadcast %79 : vector<1x16xf32> to vector<8x16xf32>
    %81 = arith.addf %78, %80 : vector<8x16xf32>
    %82 = arith.truncf %81 : vector<8x16xf32> to vector<8x16xbf16>
    %c200 = arith.constant 200 : index
    %c0_35 = arith.constant 0 : index
    %83 = vector.load %arg3[%c200, %c0_35] : memref<576x128xbf16, #tpu.memory_space<vmem>>, vector<16x64xbf16>
    %cst_36 = arith.constant dense<0.000000e+00> : vector<8x64xf32>
    %84 = tpu.matmul %82, %83, %cst_36 {dimension_numbers = #tpu.dot_dimension_numbers<[1], [0], [0], [1], [0, 0, 1, 1], [], []>} : vector<8x16xbf16>, vector<16x64xbf16>, vector<8x64xf32> -> vector<8x64xf32>
    %c8_37 = arith.constant 8 : index
    %c0_38 = arith.constant 0 : index
    %85 = vector.load %arg4[%c8_37, %c0_38] : memref<32x128xf32, #tpu.memory_space<vmem>>, vector<1x64xf32>
    %86 = vector.broadcast %85 : vector<1x64xf32> to vector<8x64xf32>
    %87 = arith.addf %84, %86 : vector<8x64xf32>
    %cst_39 = arith.constant 0.000000e+00 : f32
    %88 = vector.broadcast %cst_39 : f32 to vector<8x64xf32>
    %89 = arith.maximumf %87, %88 : vector<8x64xf32>
    %cst_40 = arith.constant dense<0.000000e+00> : vector<64xf32>
    %90 = vector.multi_reduction <add>, %89, %cst_40 [0] : vector<8x64xf32> to vector<64xf32>
    %91 = vector.shape_cast %90 : vector<64xf32> to vector<1x64xf32>
    %92 = arith.mulf %89, %89 : vector<8x64xf32>
    %cst_41 = arith.constant dense<0.000000e+00> : vector<64xf32>
    %93 = vector.multi_reduction <add>, %92, %cst_41 [0] : vector<8x64xf32> to vector<64xf32>
    %94 = vector.shape_cast %93 : vector<64xf32> to vector<1x64xf32>
    %cst_42 = arith.constant 1.250000e-01 : f32
    %95 = vector.broadcast %cst_42 : f32 to vector<1x64xf32>
    %96 = arith.mulf %91, %95 : vector<1x64xf32>
    %cst_43 = arith.constant 1.250000e-01 : f32
    %97 = vector.broadcast %cst_43 : f32 to vector<1x64xf32>
    %98 = arith.mulf %94, %97 : vector<1x64xf32>
    %99 = arith.mulf %96, %96 : vector<1x64xf32>
    %100 = arith.subf %98, %99 : vector<1x64xf32>
    %101 = vector.broadcast %96 : vector<1x64xf32> to vector<8x64xf32>
    %102 = arith.subf %89, %101 : vector<8x64xf32>
    %cst_44 = arith.constant 9.99999974E-6 : f32
    %103 = vector.broadcast %cst_44 : f32 to vector<1x64xf32>
    %104 = arith.addf %100, %103 : vector<1x64xf32>
    %105 = math.rsqrt %104 : vector<1x64xf32>
    %106 = vector.broadcast %105 : vector<1x64xf32> to vector<8x64xf32>
    %107 = arith.mulf %102, %106 : vector<8x64xf32>
    %c9 = arith.constant 9 : index
    %c0_45 = arith.constant 0 : index
    %108 = vector.load %arg4[%c9, %c0_45] : memref<32x128xf32, #tpu.memory_space<vmem>>, vector<1x64xf32>
    %109 = vector.broadcast %108 : vector<1x64xf32> to vector<8x64xf32>
    %110 = arith.mulf %107, %109 : vector<8x64xf32>
    %c10 = arith.constant 10 : index
    %c0_46 = arith.constant 0 : index
    %111 = vector.load %arg4[%c10, %c0_46] : memref<32x128xf32, #tpu.memory_space<vmem>>, vector<1x64xf32>
    %112 = vector.broadcast %111 : vector<1x64xf32> to vector<8x64xf32>
    %113 = arith.addf %110, %112 : vector<8x64xf32>
    %114 = arith.truncf %113 : vector<8x64xf32> to vector<8x64xbf16>
    %c216 = arith.constant 216 : index
    %c0_47 = arith.constant 0 : index
    %115 = vector.load %arg3[%c216, %c0_47] : memref<576x128xbf16, #tpu.memory_space<vmem>>, vector<64x64xbf16>
    %cst_48 = arith.constant dense<0.000000e+00> : vector<8x64xf32>
    %116 = tpu.matmul %114, %115, %cst_48 {dimension_numbers = #tpu.dot_dimension_numbers<[1], [0], [0], [1], [0, 0, 1, 1], [], []>} : vector<8x64xbf16>, vector<64x64xbf16>, vector<8x64xf32> -> vector<8x64xf32>
    %c11 = arith.constant 11 : index
    %c0_49 = arith.constant 0 : index
    %117 = vector.load %arg4[%c11, %c0_49] : memref<32x128xf32, #tpu.memory_space<vmem>>, vector<1x64xf32>
    %118 = vector.broadcast %117 : vector<1x64xf32> to vector<8x64xf32>
    %119 = arith.addf %116, %118 : vector<8x64xf32>
    %cst_50 = arith.constant 0.000000e+00 : f32
    %120 = vector.broadcast %cst_50 : f32 to vector<8x64xf32>
    %121 = arith.maximumf %119, %120 : vector<8x64xf32>
    %cst_51 = arith.constant dense<0.000000e+00> : vector<64xf32>
    %122 = vector.multi_reduction <add>, %121, %cst_51 [0] : vector<8x64xf32> to vector<64xf32>
    %123 = vector.shape_cast %122 : vector<64xf32> to vector<1x64xf32>
    %124 = arith.mulf %121, %121 : vector<8x64xf32>
    %cst_52 = arith.constant dense<0.000000e+00> : vector<64xf32>
    %125 = vector.multi_reduction <add>, %124, %cst_52 [0] : vector<8x64xf32> to vector<64xf32>
    %126 = vector.shape_cast %125 : vector<64xf32> to vector<1x64xf32>
    %cst_53 = arith.constant 1.250000e-01 : f32
    %127 = vector.broadcast %cst_53 : f32 to vector<1x64xf32>
    %128 = arith.mulf %123, %127 : vector<1x64xf32>
    %cst_54 = arith.constant 1.250000e-01 : f32
    %129 = vector.broadcast %cst_54 : f32 to vector<1x64xf32>
    %130 = arith.mulf %126, %129 : vector<1x64xf32>
    %131 = arith.mulf %128, %128 : vector<1x64xf32>
    %132 = arith.subf %130, %131 : vector<1x64xf32>
    %133 = vector.broadcast %128 : vector<1x64xf32> to vector<8x64xf32>
    %134 = arith.subf %121, %133 : vector<8x64xf32>
    %cst_55 = arith.constant 9.99999974E-6 : f32
    %135 = vector.broadcast %cst_55 : f32 to vector<1x64xf32>
    %136 = arith.addf %132, %135 : vector<1x64xf32>
    %137 = math.rsqrt %136 : vector<1x64xf32>
    %138 = vector.broadcast %137 : vector<1x64xf32> to vector<8x64xf32>
    %139 = arith.mulf %134, %138 : vector<8x64xf32>
    %c12 = arith.constant 12 : index
    %c0_56 = arith.constant 0 : index
    %140 = vector.load %arg4[%c12, %c0_56] : memref<32x128xf32, #tpu.memory_space<vmem>>, vector<1x64xf32>
    %141 = vector.broadcast %140 : vector<1x64xf32> to vector<8x64xf32>
    %142 = arith.mulf %139, %141 : vector<8x64xf32>
    %c13 = arith.constant 13 : index
    %c0_57 = arith.constant 0 : index
    %143 = vector.load %arg4[%c13, %c0_57] : memref<32x128xf32, #tpu.memory_space<vmem>>, vector<1x64xf32>
    %144 = vector.broadcast %143 : vector<1x64xf32> to vector<8x64xf32>
    %145 = arith.addf %142, %144 : vector<8x64xf32>
    %146 = arith.truncf %145 : vector<8x64xf32> to vector<8x64xbf16>
    %c280 = arith.constant 280 : index
    %c0_58 = arith.constant 0 : index
    %147 = vector.load %arg3[%c280, %c0_58] : memref<576x128xbf16, #tpu.memory_space<vmem>>, vector<64x64xbf16>
    %cst_59 = arith.constant dense<0.000000e+00> : vector<8x64xf32>
    %148 = tpu.matmul %146, %147, %cst_59 {dimension_numbers = #tpu.dot_dimension_numbers<[1], [0], [0], [1], [0, 0, 1, 1], [], []>} : vector<8x64xbf16>, vector<64x64xbf16>, vector<8x64xf32> -> vector<8x64xf32>
    %c14 = arith.constant 14 : index
    %c0_60 = arith.constant 0 : index
    %149 = vector.load %arg4[%c14, %c0_60] : memref<32x128xf32, #tpu.memory_space<vmem>>, vector<1x64xf32>
    %150 = vector.broadcast %149 : vector<1x64xf32> to vector<8x64xf32>
    %151 = arith.addf %148, %150 : vector<8x64xf32>
    %cst_61 = arith.constant 0.000000e+00 : f32
    %152 = vector.broadcast %cst_61 : f32 to vector<8x64xf32>
    %153 = arith.maximumf %151, %152 : vector<8x64xf32>
    %154 = arith.truncf %153 : vector<8x64xf32> to vector<8x64xbf16>
    %c344 = arith.constant 344 : index
    %c0_62 = arith.constant 0 : index
    %155 = vector.load %arg3[%c344, %c0_62] : memref<576x128xbf16, #tpu.memory_space<vmem>>, vector<64x3xbf16>
    %cst_63 = arith.constant dense<0.000000e+00> : vector<8x3xf32>
    %156 = tpu.matmul %154, %155, %cst_63 {dimension_numbers = #tpu.dot_dimension_numbers<[1], [0], [0], [1], [0, 0, 1, 1], [], []>} : vector<8x64xbf16>, vector<64x3xbf16>, vector<8x3xf32> -> vector<8x3xf32>
    %c15 = arith.constant 15 : index
    %c0_64 = arith.constant 0 : index
    %157 = vector.load %arg4[%c15, %c0_64] : memref<32x128xf32, #tpu.memory_space<vmem>>, vector<1x3xf32>
    %158 = vector.broadcast %157 : vector<1x3xf32> to vector<8x3xf32>
    %159 = arith.addf %156, %158 : vector<8x3xf32>
    %160 = arith.truncf %0 : vector<8x16xf32> to vector<8x16xbf16>
    %c408 = arith.constant 408 : index
    %c0_65 = arith.constant 0 : index
    %161 = vector.load %arg3[%c408, %c0_65] : memref<576x128xbf16, #tpu.memory_space<vmem>>, vector<16x32xbf16>
    %cst_66 = arith.constant dense<0.000000e+00> : vector<8x32xf32>
    %162 = tpu.matmul %160, %161, %cst_66 {dimension_numbers = #tpu.dot_dimension_numbers<[1], [0], [0], [1], [0, 0, 1, 1], [], []>} : vector<8x16xbf16>, vector<16x32xbf16>, vector<8x32xf32> -> vector<8x32xf32>
    %c424 = arith.constant 424 : index
    %c0_67 = arith.constant 0 : index
    %163 = vector.load %arg3[%c424, %c0_67] : memref<576x128xbf16, #tpu.memory_space<vmem>>, vector<3x32xbf16>
    %cst_68 = arith.constant dense<0.000000e+00> : vector<8x32xf32>
    %164 = tpu.matmul %3, %163, %cst_68 {dimension_numbers = #tpu.dot_dimension_numbers<[1], [0], [0], [1], [0, 0, 1, 1], [], []>} : vector<8x3xbf16>, vector<3x32xbf16>, vector<8x32xf32> -> vector<8x32xf32>
    %165 = arith.addf %162, %164 : vector<8x32xf32>
    %c16 = arith.constant 16 : index
    %c0_69 = arith.constant 0 : index
    %166 = vector.load %arg4[%c16, %c0_69] : memref<32x128xf32, #tpu.memory_space<vmem>>, vector<1x32xf32>
    %167 = vector.broadcast %166 : vector<1x32xf32> to vector<8x32xf32>
    %168 = arith.addf %165, %167 : vector<8x32xf32>
    %cst_70 = arith.constant 0.000000e+00 : f32
    %169 = vector.broadcast %cst_70 : f32 to vector<8x32xf32>
    %170 = arith.maximumf %168, %169 : vector<8x32xf32>
    %cst_71 = arith.constant dense<0.000000e+00> : vector<32xf32>
    %171 = vector.multi_reduction <add>, %170, %cst_71 [0] : vector<8x32xf32> to vector<32xf32>
    %172 = vector.shape_cast %171 : vector<32xf32> to vector<1x32xf32>
    %173 = arith.mulf %170, %170 : vector<8x32xf32>
    %cst_72 = arith.constant dense<0.000000e+00> : vector<32xf32>
    %174 = vector.multi_reduction <add>, %173, %cst_72 [0] : vector<8x32xf32> to vector<32xf32>
    %175 = vector.shape_cast %174 : vector<32xf32> to vector<1x32xf32>
    %cst_73 = arith.constant 1.250000e-01 : f32
    %176 = vector.broadcast %cst_73 : f32 to vector<1x32xf32>
    %177 = arith.mulf %172, %176 : vector<1x32xf32>
    %cst_74 = arith.constant 1.250000e-01 : f32
    %178 = vector.broadcast %cst_74 : f32 to vector<1x32xf32>
    %179 = arith.mulf %175, %178 : vector<1x32xf32>
    %180 = arith.mulf %177, %177 : vector<1x32xf32>
    %181 = arith.subf %179, %180 : vector<1x32xf32>
    %182 = vector.broadcast %177 : vector<1x32xf32> to vector<8x32xf32>
    %183 = arith.subf %170, %182 : vector<8x32xf32>
    %cst_75 = arith.constant 9.99999974E-6 : f32
    %184 = vector.broadcast %cst_75 : f32 to vector<1x32xf32>
    %185 = arith.addf %181, %184 : vector<1x32xf32>
    %186 = math.rsqrt %185 : vector<1x32xf32>
    %187 = vector.broadcast %186 : vector<1x32xf32> to vector<8x32xf32>
    %188 = arith.mulf %183, %187 : vector<8x32xf32>
    %c17 = arith.constant 17 : index
    %c0_76 = arith.constant 0 : index
    %189 = vector.load %arg4[%c17, %c0_76] : memref<32x128xf32, #tpu.memory_space<vmem>>, vector<1x32xf32>
    %190 = vector.broadcast %189 : vector<1x32xf32> to vector<8x32xf32>
    %191 = arith.mulf %188, %190 : vector<8x32xf32>
    %c18 = arith.constant 18 : index
    %c0_77 = arith.constant 0 : index
    %192 = vector.load %arg4[%c18, %c0_77] : memref<32x128xf32, #tpu.memory_space<vmem>>, vector<1x32xf32>
    %193 = vector.broadcast %192 : vector<1x32xf32> to vector<8x32xf32>
    %194 = arith.addf %191, %193 : vector<8x32xf32>
    %195 = arith.truncf %194 : vector<8x32xf32> to vector<8x32xbf16>
    %c432 = arith.constant 432 : index
    %c0_78 = arith.constant 0 : index
    %196 = vector.load %arg3[%c432, %c0_78] : memref<576x128xbf16, #tpu.memory_space<vmem>>, vector<32x32xbf16>
    %cst_79 = arith.constant dense<0.000000e+00> : vector<8x32xf32>
    %197 = tpu.matmul %195, %196, %cst_79 {dimension_numbers = #tpu.dot_dimension_numbers<[1], [0], [0], [1], [0, 0, 1, 1], [], []>} : vector<8x32xbf16>, vector<32x32xbf16>, vector<8x32xf32> -> vector<8x32xf32>
    %c19 = arith.constant 19 : index
    %c0_80 = arith.constant 0 : index
    %198 = vector.load %arg4[%c19, %c0_80] : memref<32x128xf32, #tpu.memory_space<vmem>>, vector<1x32xf32>
    %199 = vector.broadcast %198 : vector<1x32xf32> to vector<8x32xf32>
    %200 = arith.addf %197, %199 : vector<8x32xf32>
    %cst_81 = arith.constant 0.000000e+00 : f32
    %201 = vector.broadcast %cst_81 : f32 to vector<8x32xf32>
    %202 = arith.maximumf %200, %201 : vector<8x32xf32>
    %203 = arith.truncf %202 : vector<8x32xf32> to vector<8x32xbf16>
    %c464 = arith.constant 464 : index
    %c0_82 = arith.constant 0 : index
    %204 = vector.load %arg3[%c464, %c0_82] : memref<576x128xbf16, #tpu.memory_space<vmem>>, vector<32x16xbf16>
    %cst_83 = arith.constant dense<0.000000e+00> : vector<8x16xf32>
    %205 = tpu.matmul %203, %204, %cst_83 {dimension_numbers = #tpu.dot_dimension_numbers<[1], [0], [0], [1], [0, 0, 1, 1], [], []>} : vector<8x32xbf16>, vector<32x16xbf16>, vector<8x16xf32> -> vector<8x16xf32>
    %c20 = arith.constant 20 : index
    %c0_84 = arith.constant 0 : index
    %206 = vector.load %arg4[%c20, %c0_84] : memref<32x128xf32, #tpu.memory_space<vmem>>, vector<1x16xf32>
    %207 = vector.broadcast %206 : vector<1x16xf32> to vector<8x16xf32>
    %208 = arith.addf %205, %207 : vector<8x16xf32>
    %209 = vector.extract_strided_slice %208 {offsets = [0, 0], sizes = [8, 8], strides = [1, 1]} : vector<8x16xf32> to vector<8x8xf32>
    %210 = vector.extract_strided_slice %208 {offsets = [0, 8], sizes = [8, 8], strides = [1, 1]} : vector<8x16xf32> to vector<8x8xf32>
    %cst_85 = arith.constant 5.000000e-01 : f32
    %211 = vector.broadcast %cst_85 : f32 to vector<8x8xf32>
    %212 = arith.mulf %211, %210 : vector<8x8xf32>
    %213 = math.exp %212 : vector<8x8xf32>
    %214 = arith.mulf %2, %213 : vector<8x8xf32>
    %215 = arith.addf %209, %214 : vector<8x8xf32>
    %216 = arith.truncf %215 : vector<8x8xf32> to vector<8x8xbf16>
    %c496 = arith.constant 496 : index
    %c0_86 = arith.constant 0 : index
    %217 = vector.load %arg3[%c496, %c0_86] : memref<576x128xbf16, #tpu.memory_space<vmem>>, vector<8x32xbf16>
    %cst_87 = arith.constant dense<0.000000e+00> : vector<8x32xf32>
    %218 = tpu.matmul %216, %217, %cst_87 {dimension_numbers = #tpu.dot_dimension_numbers<[1], [0], [0], [1], [0, 0, 1, 1], [], []>} : vector<8x8xbf16>, vector<8x32xbf16>, vector<8x32xf32> -> vector<8x32xf32>
    %c504 = arith.constant 504 : index
    %c0_88 = arith.constant 0 : index
    %219 = vector.load %arg3[%c504, %c0_88] : memref<576x128xbf16, #tpu.memory_space<vmem>>, vector<3x32xbf16>
    %cst_89 = arith.constant dense<0.000000e+00> : vector<8x32xf32>
    %220 = tpu.matmul %3, %219, %cst_89 {dimension_numbers = #tpu.dot_dimension_numbers<[1], [0], [0], [1], [0, 0, 1, 1], [], []>} : vector<8x3xbf16>, vector<3x32xbf16>, vector<8x32xf32> -> vector<8x32xf32>
    %221 = arith.addf %218, %220 : vector<8x32xf32>
    %c21 = arith.constant 21 : index
    %c0_90 = arith.constant 0 : index
    %222 = vector.load %arg4[%c21, %c0_90] : memref<32x128xf32, #tpu.memory_space<vmem>>, vector<1x32xf32>
    %223 = vector.broadcast %222 : vector<1x32xf32> to vector<8x32xf32>
    %224 = arith.addf %221, %223 : vector<8x32xf32>
    %cst_91 = arith.constant 0.000000e+00 : f32
    %225 = vector.broadcast %cst_91 : f32 to vector<8x32xf32>
    %226 = arith.maximumf %224, %225 : vector<8x32xf32>
    %cst_92 = arith.constant dense<0.000000e+00> : vector<32xf32>
    %227 = vector.multi_reduction <add>, %226, %cst_92 [0] : vector<8x32xf32> to vector<32xf32>
    %228 = vector.shape_cast %227 : vector<32xf32> to vector<1x32xf32>
    %229 = arith.mulf %226, %226 : vector<8x32xf32>
    %cst_93 = arith.constant dense<0.000000e+00> : vector<32xf32>
    %230 = vector.multi_reduction <add>, %229, %cst_93 [0] : vector<8x32xf32> to vector<32xf32>
    %231 = vector.shape_cast %230 : vector<32xf32> to vector<1x32xf32>
    %cst_94 = arith.constant 1.250000e-01 : f32
    %232 = vector.broadcast %cst_94 : f32 to vector<1x32xf32>
    %233 = arith.mulf %228, %232 : vector<1x32xf32>
    %cst_95 = arith.constant 1.250000e-01 : f32
    %234 = vector.broadcast %cst_95 : f32 to vector<1x32xf32>
    %235 = arith.mulf %231, %234 : vector<1x32xf32>
    %236 = arith.mulf %233, %233 : vector<1x32xf32>
    %237 = arith.subf %235, %236 : vector<1x32xf32>
    %238 = vector.broadcast %233 : vector<1x32xf32> to vector<8x32xf32>
    %239 = arith.subf %226, %238 : vector<8x32xf32>
    %cst_96 = arith.constant 9.99999974E-6 : f32
    %240 = vector.broadcast %cst_96 : f32 to vector<1x32xf32>
    %241 = arith.addf %237, %240 : vector<1x32xf32>
    %242 = math.rsqrt %241 : vector<1x32xf32>
    %243 = vector.broadcast %242 : vector<1x32xf32> to vector<8x32xf32>
    %244 = arith.mulf %239, %243 : vector<8x32xf32>
    %c22 = arith.constant 22 : index
    %c0_97 = arith.constant 0 : index
    %245 = vector.load %arg4[%c22, %c0_97] : memref<32x128xf32, #tpu.memory_space<vmem>>, vector<1x32xf32>
    %246 = vector.broadcast %245 : vector<1x32xf32> to vector<8x32xf32>
    %247 = arith.mulf %244, %246 : vector<8x32xf32>
    %c23 = arith.constant 23 : index
    %c0_98 = arith.constant 0 : index
    %248 = vector.load %arg4[%c23, %c0_98] : memref<32x128xf32, #tpu.memory_space<vmem>>, vector<1x32xf32>
    %249 = vector.broadcast %248 : vector<1x32xf32> to vector<8x32xf32>
    %250 = arith.addf %247, %249 : vector<8x32xf32>
    %251 = arith.truncf %250 : vector<8x32xf32> to vector<8x32xbf16>
    %c512 = arith.constant 512 : index
    %c0_99 = arith.constant 0 : index
    %252 = vector.load %arg3[%c512, %c0_99] : memref<576x128xbf16, #tpu.memory_space<vmem>>, vector<32x32xbf16>
    %cst_100 = arith.constant dense<0.000000e+00> : vector<8x32xf32>
    %253 = tpu.matmul %251, %252, %cst_100 {dimension_numbers = #tpu.dot_dimension_numbers<[1], [0], [0], [1], [0, 0, 1, 1], [], []>} : vector<8x32xbf16>, vector<32x32xbf16>, vector<8x32xf32> -> vector<8x32xf32>
    %c24 = arith.constant 24 : index
    %c0_101 = arith.constant 0 : index
    %254 = vector.load %arg4[%c24, %c0_101] : memref<32x128xf32, #tpu.memory_space<vmem>>, vector<1x32xf32>
    %255 = vector.broadcast %254 : vector<1x32xf32> to vector<8x32xf32>
    %256 = arith.addf %253, %255 : vector<8x32xf32>
    %cst_102 = arith.constant 0.000000e+00 : f32
    %257 = vector.broadcast %cst_102 : f32 to vector<8x32xf32>
    %258 = arith.maximumf %256, %257 : vector<8x32xf32>
    %cst_103 = arith.constant dense<0.000000e+00> : vector<32xf32>
    %259 = vector.multi_reduction <add>, %258, %cst_103 [0] : vector<8x32xf32> to vector<32xf32>
    %260 = vector.shape_cast %259 : vector<32xf32> to vector<1x32xf32>
    %261 = arith.mulf %258, %258 : vector<8x32xf32>
    %cst_104 = arith.constant dense<0.000000e+00> : vector<32xf32>
    %262 = vector.multi_reduction <add>, %261, %cst_104 [0] : vector<8x32xf32> to vector<32xf32>
    %263 = vector.shape_cast %262 : vector<32xf32> to vector<1x32xf32>
    %cst_105 = arith.constant 1.250000e-01 : f32
    %264 = vector.broadcast %cst_105 : f32 to vector<1x32xf32>
    %265 = arith.mulf %260, %264 : vector<1x32xf32>
    %cst_106 = arith.constant 1.250000e-01 : f32
    %266 = vector.broadcast %cst_106 : f32 to vector<1x32xf32>
    %267 = arith.mulf %263, %266 : vector<1x32xf32>
    %268 = arith.mulf %265, %265 : vector<1x32xf32>
    %269 = arith.subf %267, %268 : vector<1x32xf32>
    %270 = vector.broadcast %265 : vector<1x32xf32> to vector<8x32xf32>
    %271 = arith.subf %258, %270 : vector<8x32xf32>
    %cst_107 = arith.constant 9.99999974E-6 : f32
    %272 = vector.broadcast %cst_107 : f32 to vector<1x32xf32>
    %273 = arith.addf %269, %272 : vector<1x32xf32>
    %274 = math.rsqrt %273 : vector<1x32xf32>
    %275 = vector.broadcast %274 : vector<1x32xf32> to vector<8x32xf32>
    %276 = arith.mulf %271, %275 : vector<8x32xf32>
    %c25 = arith.constant 25 : index
    %c0_108 = arith.constant 0 : index
    %277 = vector.load %arg4[%c25, %c0_108] : memref<32x128xf32, #tpu.memory_space<vmem>>, vector<1x32xf32>
    %278 = vector.broadcast %277 : vector<1x32xf32> to vector<8x32xf32>
    %279 = arith.mulf %276, %278 : vector<8x32xf32>
    %c26 = arith.constant 26 : index
    %c0_109 = arith.constant 0 : index
    %280 = vector.load %arg4[%c26, %c0_109] : memref<32x128xf32, #tpu.memory_space<vmem>>, vector<1x32xf32>
    %281 = vector.broadcast %280 : vector<1x32xf32> to vector<8x32xf32>
    %282 = arith.addf %279, %281 : vector<8x32xf32>
    %283 = arith.truncf %282 : vector<8x32xf32> to vector<8x32xbf16>
    %c544 = arith.constant 544 : index
    %c0_110 = arith.constant 0 : index
    %284 = vector.load %arg3[%c544, %c0_110] : memref<576x128xbf16, #tpu.memory_space<vmem>>, vector<32x16xbf16>
    %cst_111 = arith.constant dense<0.000000e+00> : vector<8x16xf32>
    %285 = tpu.matmul %283, %284, %cst_111 {dimension_numbers = #tpu.dot_dimension_numbers<[1], [0], [0], [1], [0, 0, 1, 1], [], []>} : vector<8x32xbf16>, vector<32x16xbf16>, vector<8x16xf32> -> vector<8x16xf32>
    %c27 = arith.constant 27 : index
    %c0_112 = arith.constant 0 : index
    %286 = vector.load %arg4[%c27, %c0_112] : memref<32x128xf32, #tpu.memory_space<vmem>>, vector<1x16xf32>
    %287 = vector.broadcast %286 : vector<1x16xf32> to vector<8x16xf32>
    %288 = arith.addf %285, %287 : vector<8x16xf32>
    %cst_113 = arith.constant 0.000000e+00 : f32
    %289 = vector.broadcast %cst_113 : f32 to vector<8x77xf32>
    %290 = tpu.concatenate %288, %208, %81, %159, %289 in 1 : vector<8x16xf32>, vector<8x16xf32>, vector<8x16xf32>, vector<8x3xf32>, vector<8x77xf32> -> vector<8x128xf32>
    %c0_114 = arith.constant 0 : index
    %c0_115 = arith.constant 0 : index
    %291 = vector.load %arg5[%c0_114, %c0_115] : memref<8x128xf32, #tpu.memory_space<vmem>>, vector<8x128xf32>
    tpu.vector_store %arg5[%c0_114, %c0_115], %290 {strides = array<i32>} : memref<8x128xf32, #tpu.memory_space<vmem>>, vector<8x128xf32>,
    return
  }
}

</mosaic_0001>

<bundles_post_ra>
// kernel: forward.1
= control target key start
LH: loop header
LB: loop body
LE: loop exit
PB: predicated region body
PF: predicated region fallthrough
CT: control target
= control target key end

     0   :  { %10 = vsyncpa [#allocation3], 0  ;;  %s1991_s0 = inlined_call_operand.vmem [shape: f32[8,16], index: 0, kind: input, shape index: {}]   ;;  %s1992_s1 = inlined_call_operand.vmem [shape: f32[8,3], index: 1, kind: input, shape index: {}]   ;;  %s1993_s2 = inlined_call_operand.hbm [shape: f32[8,8], index: 2, kind: input, shape index: {}]   ;;  %s1994_s3 = inlined_call_operand.hbm [shape: bf16[576,128], index: 3, kind: input, shape index: {}]   ;;  %s1995_s4 = inlined_call_operand.hbm [shape: f32[32,128], index: 4, kind: input, shape index: {}]   ;;  %s1996_s5 = inlined_call_operand.vmem [shape: f32[8,128], index: 5, kind: output, shape index: {}]  }
   0x1   :  { %11 = vsyncpa [#allocation5], 0  ;;  %s1818_s18 = smov [#allocation4]  }
   0x2   :  { %s31_s19 = sshll.u32 %s1818_s18, 4  ;;  %s32_s19 = int_to_ptr.vmem [resolvable:$true] %s31_s19 }
   0x3   :  { %s1762_s20 = scalar_lea.vmem %s32_s19, 4608  ;;  %p1767_p1 = scmp.lt.s32.totalorder %s32_s19, %s32_s19 }
   0x4   :  { %p1763_p0 = scmp.ne.s32.totalorder %s32_s19, %s1762_s20  ;;  %p1768_p2 = scmp.lt.s32.totalorder %s1762_s20, %s1762_s20 }
   0x6   :  { %p1769_p3 = por %p1768_p2, %p1767_p1 }
   0x8   :  { %p1770_p4 = pnand %p1769_p3, %p1763_p0 }
   0xa   :  { %1773 = shalt.err (!%p1770_p4)
}
   0xb   :  { %s1819_s21 = smov 64   ;;  %s1820_s22 = smov 4  }
   0xc   :  { %37 = dma.hbm_to_vmem [thread:$0]  %s1994_s3, 4608, %s32_s19, [#allocation5], %s1819_s21, %s1819_s21, %s1820_s22  }
   0xd   :  { %s1821_s25 = smov [#allocation2]   ;;  %s1822_s27 = smov [#allocation6]  }
   0xe   :  { %s22_s26 = sshll.u32 %s1821_s25, 4  ;;  %s43_s28 = sshll.u32 %s1822_s27, 4  ;;  %s23_s26 = int_to_ptr.vmem [resolvable:$true] %s22_s26  ;;  %s44_s28 = int_to_ptr.vmem [resolvable:$true] %s43_s28 }
   0xf   :  { %s1782_s29 = scalar_lea.vmem %s23_s26, 128  ;;  %p1787_p6 = scmp.lt.s32.totalorder %s23_s26, %s23_s26 }
  0x10   :  { %p1783_p5 = scmp.ne.s32.totalorder %s23_s26, %s1782_s29  ;;  %p1788_p7 = scmp.lt.s32.totalorder %s1782_s29, %s1782_s29 }
  0x12   :  { %p1789_p8 = por %p1788_p7, %p1787_p6 }
  0x14   :  { %p1790_p9 = pnand %p1789_p8, %p1783_p5 }
  0x16   :  { %1793 = shalt.err (!%p1790_p9)
}
  0x17   :  { %25 = dma.hbm_to_vmem [thread:$0]  %s1993_s2, 128, %s23_s26, [#allocation3]  }
  0x18   :  { %s1802_s7 = scalar_lea.vmem %s44_s28, 512  ;;  %p1807_p11 = scmp.lt.s32.totalorder %s44_s28, %s44_s28 }
  0x19   :  { %p1803_p10 = scmp.ne.s32.totalorder %s44_s28, %s1802_s7  ;;  %p1808_p12 = scmp.lt.s32.totalorder %s1802_s7, %s1802_s7 }
  0x1b   :  { %p1809_p13 = por %p1808_p12, %p1807_p11 }
  0x1d   :  { %p1810_p0 = pnand %p1809_p13, %p1803_p10 }
  0x1f   :  { %1813 = shalt.err (!%p1810_p0)
}
  0x20   :  { %s1823_s3 = smov 128   ;;  %s1824_s8 = smov 8  }
  0x21   :  { %49 = dma.hbm_to_vmem [thread:$0]  %s1995_s4, 512, %s44_s28, [#allocation5], %s1823_s3, %s1823_s3, %s1824_s8  }
  0x22   :  { %1814 = dma.done.wait [#allocation3], 128  }
  0x23   :  { %1815 = vsyncadd [#allocation3], 4294967168 }
  0x24   :  { %1816 = dma.done.wait [#allocation5], 5120  }
  0x25   :  { %1817 = vsyncadd [#allocation5], 4294962176  ;;  %vm74_vm0 = vcmask 1040384   ;;  %v1825_v0 = vmov 0.0   ;;  %vm75_vm1 = vcmask 1041408   ;;  %v1826_v1 = vmov 65535  }
  0x26   :  { %1550 = vmatprep.subr.bf16.mxu0 %v1825_v0  ;;  %1556 = vmatprep.subr.bf16.mxu1 %v1825_v0  ;;  %v76_v2 = vsel %vm74_vm0, 4294967295, %v1826_v1  ;;  %vm1827_vm2 = vmmov 0   ;;  %v64_v4 = vld [vmem:[#allocation4] sm:$0x3]  ;;  %v61_v6 = vld [vmem:[%s1992_s1] sm:$0xff]  ;;  %vm70_vm3 = vcmask 23552  }
  0x27   :  { %1552 = vmatprep.mubr.msk.bf16.mxu0 %vm1827_vm2, %v1825_v0  ;;  %1564 = vmatprep.mubr.msk.bf16.mxu1 %vm1827_vm2, %v1825_v0  ;;  %v1877_v3 = vsel %vm75_vm1, %v76_v2, 0  ;;  %v1883_v7 = vpack.c.bf16 %v61_v6, %v61_v6  ;;  %v1704_v8 = vld [vmem:[#allocation4 + $0x1c] sm:$0xff]   ;;  %v1705_v9 = vld [vmem:[#allocation4 + $0x14] sm:$0xff]   ;;  %v1706_v10 = vld [vmem:[#allocation4 + $0xc] sm:$0xff]   ;;  %vm122_vm4 = vcmask 523264   ;;  %vm452_vm5 = vcmask 130048  }
  0x28   :  { %v79_v5 = vand.u32 %v1877_v3, %v64_v4  ;;  %1557 = vmatpush3.bf16.msra.mxu1 %v1704_v8  ;;  %v1707_v11 = vld [vmem:[#allocation4 + $0x4] sm:$0xff]   ;;  %v1418_v12 = vld [vmem:[#allocation6] ss:$0 sm:$0xff]  ;;  %v1420_v41 = vld [vmem:[#allocation6 + $0x1] ss:$0 sm:$0xff]  ;;  %s1828_s1 = smov 32  }
  0x29   :  { %1558 = vmatprep.subr.bf16.mxu1 %v1825_v0  ;;  %v1421_v43 = vld [vmem:[#allocation6 + $0x2] ss:$0 sm:$0xff]  ;;  %v1709_v48 = vld [vmem:[#allocation4 + $0x34] sm:$0xff]   ;;  %v1710_v49 = vld [vmem:[#allocation4 + $0x2c] sm:$0xff]   ;;  %vm915_vm6 = vcmask 261120   ;;  %vm1141_vm7 = vcmask 1043456  }
  0x2a   :  { %1551 = vmatpush3.bf16.msra.mxu0 %v79_v5  ;;  %v1708_v47 = vld [vmem:[#allocation4 + $0x3c] sm:$0xff]   ;;  %v1711_v50 = vld [vmem:[#allocation4 + $0x24] sm:$0xff]   ;;  %v1713_v52 = vld [vmem:[#allocation4 + $0x54] sm:$0xff]   ;;  %s1830_s13 = smov 120   ;;  %s1831_s14 = smov 16   ;;  %vm1137_vm8 = vcmask 64512  }
  0x2b   :  { %1568 = vmatprep.subr.bf16.mxu0 %v1825_v0  ;;  %v1712_v51 = vld [vmem:[#allocation4 + $0x5c] sm:$0xff]   ;;  %vm1407_vm9 = vcmask 392192   ;;  %vm1409_vm10 = vcmask 416768  }
  0x2c   :  { %1559 = vmatpush3.bf16.msra.mxu1 %v1705_v9  ;;  %v1422_v53 = vld [vmem:[#allocation6 + $0x3] ss:$0 sm:$0xff] }
  0x2d   :  { %1553 = vmatmul.mubr.msk.bf16.vlgmr.msra.gmra.mxu0 %vm70_vm3, %v1883_v7  ;;  %1560 = vmatprep.subr.bf16.mxu1 %v1825_v0 }
  0x2e   :  { %1576 = vmatprep.mubr.msk.bf16.mxu0 %vm1827_vm2, %v1825_v0  ;;  %1569 = vmatpush3.bf16.msra.mxu0 %v1708_v47  ;;  %v1719_v47 = vld [vmem:[#allocation4 + $0x74] sm:$0xff]  }
  0x2f   :  { %1570 = vmatprep.subr.bf16.mxu0 %v1825_v0 }
  0x30   :  { %1561 = vmatpush3.bf16.msra.mxu1 %v1706_v10 }
  0x31   :  { %1562 = vmatprep.subr.bf16.mxu1 %v1825_v0 }
  0x32   :  { %1571 = vmatpush3.bf16.msra.mxu0 %v1709_v48  ;;  %v1720_v48 = vld [vmem:[#allocation4 + $0x6c] sm:$0xff]  }
  0x33   :  { %1572 = vmatprep.subr.bf16.mxu0 %v1825_v0 }
  0x34   :  { %1563 = vmatpush3.bf16.msra.mxu1 %v1707_v11 }
  0x35   :  { %1580 = vmatprep.subr.bf16.mxu1 %v1825_v0 }
  0x36   :  { %1573 = vmatpush3.bf16.msra.mxu0 %v1710_v49  ;;  %v1442_v49 = vld [vmem:[#allocation6 + $0x8] ss:$0 sm:$0xff] }
  0x37   :  { %1574 = vmatprep.subr.bf16.mxu0 %v1825_v0 }
  0x3a   :  { %1575 = vmatpush3.bf16.msra.mxu0 %v1711_v50 }
  0x3b   :  { %1592 = vmatprep.subr.bf16.mxu0 %v1825_v0 }
  0xed   :  { %v115_v13 = vpop.f32.mrf.mxu0 }
  0xee   :  { %v116_v14 = vadd.f32 %v1418_v12, %v115_v13 }
  0xef   :  { %v1554_v15 = vpop.f32.mrf.mxu0 }
  0xf0   :  { %v121_v16 = vmax.f32 %v116_v14, 0.0 }
  0xf1   :  { %v118_v17 = vpop.f32.mrf.mxu0 }
  0xf2   :  { %v123_v18 = vsel %vm122_vm4, %v121_v16, 0.0  ;;  %v130_v19 = vmul.f32 %v121_v16, %v121_v16 }
  0xf3   :  { %v124_v20 = vrot.slane %v123_v18, 4  ;;  %v1555_v21 = vpop.f32.mrf.mxu0 }
  0xf4   :  { %v131_v22 = vsel %vm122_vm4, %v130_v19, 0.0  ;;  %v1428_v21 = vld [vmem:[#allocation6 + $0x4] ss:$0 sm:$0xff] }
  0xf5   :  { %v125_v23 = vadd.f32 %v124_v20, %v123_v18  ;;  %v132_v24 = vrot.slane %v131_v22, 4 }
  0xf7   :  { %v126_v25 = vrot.slane %v125_v23, 2  ;;  %v133_v26 = vadd.f32 %v132_v24, %v131_v22 }
  0xf9   :  { %v127_v27 = vadd.f32 %v126_v25, %v125_v23  ;;  %v134_v28 = vrot.slane %v133_v26, 2  ;;  %v1429_v23 = vld [vmem:[#allocation6 + $0x5] ss:$0 sm:$0xff] }
  0xfb   :  { %v128_v29 = vrot.slane %v127_v27, 1  ;;  %v135_v30 = vadd.f32 %v134_v28, %v133_v26  ;;  %v1715_v28 = vld [vmem:[#allocation4 + $0x44] sm:$0xff]  }
  0xfd   :  { %v129_v31 = vadd.f32 %v128_v29, %v127_v27  ;;  %v136_v32 = vrot.slane %v135_v30, 1  ;;  %v1714_v27 = vld [vmem:[#allocation4 + $0x4c] sm:$0xff]   ;;  %v1716_v29 = vld [vmem:[#allocation4 + $0x64] sm:$0xff]  }
  0xff   :  { %v137_v33 = vadd.f32 %v136_v32, %v135_v30  ;;  %v138_v34 = vmul.f32 0.125, %v129_v31  ;;  %v1430_v30 = vld [vmem:[#allocation6 + $0x6] ss:$0 sm:$0xff] }
 0x101   :  { %v139_v35 = vmul.f32 0.125, %v137_v33  ;;  %v140_v36 = vmul.f32 %v138_v34, %v138_v34  ;;  %v142_v39 = vsub.f32 %v121_v16, %v138_v34 }
 0x103   :  { %v141_v37 = vsub.f32 %v139_v35, %v140_v36 }
 0x105   :  { %v143_v38 = vadd.f32 1e-05, %v141_v37 }
 0x107   :  { %1738 = vrsqrt.f32 %v143_v38  ;;  %v1436_v38 = vld [vmem:[#allocation6 + $0x7] ss:$0 sm:$0xff] }
 0x114   :  { %v1739_v40 = vpop.eup %1738 }
 0x115   :  { %v145_v42 = vmul.f32 %v1739_v40, %v142_v39 }
 0x117   :  { %v151_v44 = vmul.f32 %v1420_v41, %v145_v42 }
 0x119   :  { %v157_v45 = vadd.f32 %v1421_v43, %v151_v44 }
 0x11b   :  { %v158_v46 = vpack.c.bf16 %v157_v45, %v157_v45  ;;  %v1717_v45 = vld [vmem:[#allocation4 + $0x84] sm:$0xff]  }
 0x11d   :  { %1565 = vmatmul.mubr.msk.bf16.vlgmr.msra.gmra.mxu1 %vm122_vm4, %v158_v46  ;;  %v1718_v46 = vld [vmem:[#allocation4 + $0x7c] sm:$0xff]  }
 0x11e   :  { %1588 = vmatprep.mubr.msk.bf16.mxu1 %vm1827_vm2, %v1825_v0  ;;  %1581 = vmatpush3.bf16.msra.mxu1 %v1712_v51 }
 0x11f   :  { %1582 = vmatprep.subr.bf16.mxu1 %v1825_v0 }
 0x122   :  { %1583 = vmatpush3.bf16.msra.mxu1 %v1713_v52 }
 0x123   :  { %1584 = vmatprep.subr.bf16.mxu1 %v1825_v0 }
 0x126   :  { %1585 = vmatpush3.bf16.msra.mxu1 %v1714_v27  ;;  %v1726_v27 = vld [vmem:[#allocation4 + $0xc4] sm:$0xff]  }
 0x127   :  { %1586 = vmatprep.subr.bf16.mxu1 %v1825_v0 }
 0x12a   :  { %1587 = vmatpush3.bf16.msra.mxu1 %v1715_v28  ;;  %v1727_v28 = vld [vmem:[#allocation4 + $0xbc] sm:$0xff]  }
 0x12b   :  { %1610 = vmatprep.subr.bf16.mxu1 %v1825_v0 }
 0x1dd   :  { %v233_v54 = vpop.f32.mrf.mxu1 }
 0x1de   :  { %v234_v55 = vadd.f32 %v1422_v53, %v233_v54 }
 0x1df   :  { %v1566_v56 = vpop.f32.mrf.mxu1 }
 0x1e0   :  { %v239_v57 = vmax.f32 %v234_v55, 0.0 }
 0x1e1   :  { %v236_v58 = vpop.f32.mrf.mxu1 }
 0x1e2   :  { %v240_v59 = vsel %vm122_vm4, %v239_v57, 0.0  ;;  %v247_v60 = vmul.f32 %v239_v57, %v239_v57 }
 0x1e3   :  { %v241_v61 = vrot.slane %v240_v59, 4  ;;  %v1567_v62 = vpop.f32.mrf.mxu1 }
 0x1e4   :  { %v248_v63 = vsel %vm122_vm4, %v247_v60, 0.0 }
 0x1e5   :  { %v242_v1 = vadd.f32 %v241_v61, %v240_v59  ;;  %v249_v2 = vrot.slane %v248_v63, 4 }
 0x1e7   :  { %v243_v4 = vrot.slane %v242_v1, 2  ;;  %v250_v5 = vadd.f32 %v249_v2, %v248_v63 }
 0x1e9   :  { %v244_v6 = vadd.f32 %v243_v4, %v242_v1  ;;  %v251_v8 = vrot.slane %v250_v5, 2 }
 0x1eb   :  { %v245_v9 = vrot.slane %v244_v6, 1  ;;  %v252_v10 = vadd.f32 %v251_v8, %v250_v5 }
 0x1ed   :  { %v246_v11 = vadd.f32 %v245_v9, %v244_v6  ;;  %v253_v12 = vrot.slane %v252_v10, 1 }
 0x1ef   :  { %v254_v13 = vadd.f32 %v253_v12, %v252_v10  ;;  %v255_v14 = vmul.f32 0.125, %v246_v11 }
 0x1f1   :  { %v256_v15 = vmul.f32 0.125, %v254_v13  ;;  %v257_v16 = vmul.f32 %v255_v14, %v255_v14  ;;  %v259_v19 = vsub.f32 %v239_v57, %v255_v14 }
 0x1f3   :  { %v258_v17 = vsub.f32 %v256_v15, %v257_v16 }
 0x1f5   :  { %v260_v18 = vadd.f32 1e-05, %v258_v17  ;;  %v1445_v17 = vld [vmem:[#allocation6 + $0x9] ss:$0 sm:$0xff] }
 0x1f7   :  { %1740 = vrsqrt.f32 %v260_v18 }
 0x204   :  { %v1741_v20 = vpop.eup %1740 }
 0x205   :  { %v262_v22 = vmul.f32 %v1741_v20, %v259_v19  ;;  %v1446_v19 = vld [vmem:[#allocation6 + $0xa] ss:$0 sm:$0xff] }
 0x207   :  { %v268_v24 = vmul.f32 %v1428_v21, %v262_v22 }
 0x209   :  { %v274_v25 = vadd.f32 %v1429_v23, %v268_v24  ;;  %v1721_v23 = vld [vmem:[#allocation4 + $0xa4] sm:$0xff]   ;;  %v1722_v24 = vld [vmem:[#allocation4 + $0x9c] sm:$0xff]  }
 0x20b   :  { %v275_v26 = vpack.c.bf16 %v274_v25, %v274_v25  ;;  %v1723_v25 = vld [vmem:[#allocation4 + $0x94] sm:$0xff]  }
 0x20d   :  { %1577 = vmatmul.mubr.msk.bf16.vlgmr.msra.gmra.mxu0 %vm122_vm4, %v275_v26  ;;  %v1724_v26 = vld [vmem:[#allocation4 + $0x8c] sm:$0xff]  }
 0x20e   :  { %1594 = vmatprep.mubr.msk.bf16.mxu0 %vm1827_vm2, %v1825_v0  ;;  %1593 = vmatpush3.bf16.msra.mxu0 %v1716_v29  ;;  %v1447_v29 = vld [vmem:[#allocation6 + $0xb] ss:$0 sm:$0xff] }
 0x20f   :  { %1598 = vmatprep.subr.bf16.mxu0 %v1825_v0 }
 0x2cd   :  { %v350_v31 = vpop.f32.mrf.mxu0 }
 0x2ce   :  { %v351_v32 = vadd.f32 %v1430_v30, %v350_v31 }
 0x2cf   :  { %v1578_v33 = vpop.f32.mrf.mxu0 }
 0x2d0   :  { %v356_v34 = vmax.f32 %v351_v32, 0.0 }
 0x2d1   :  { %v353_v35 = vpop.f32.mrf.mxu0 }
 0x2d2   :  { %v357_v36 = vpack.c.bf16 %v356_v34, %v356_v34 }
 0x2d3   :  { %v1579_v37 = vpop.f32.mrf.mxu0 }
 0x2d4   :  { %1589 = vmatmul.mubr.msk.bf16.vlgmr.msra.gmra.mxu1 %vm122_vm4, %v357_v36 }
 0x2d5   :  { %1618 = vmatprep.mubr.msk.bf16.mxu1 %vm1827_vm2, %v1825_v0  ;;  %1611 = vmatpush3.bf16.msra.mxu1 %v1721_v23 }
 0x2d6   :  { %1612 = vmatprep.subr.bf16.mxu1 %v1825_v0 }
 0x2d9   :  { %1613 = vmatpush3.bf16.msra.mxu1 %v1722_v24 }
 0x2da   :  { %1614 = vmatprep.subr.bf16.mxu1 %v1825_v0 }
 0x2dd   :  { %1615 = vmatpush3.bf16.msra.mxu1 %v1723_v25  ;;  %v1470_v25 = vld [vmem:[#allocation6 + $0x10] ss:$0 sm:$0xff] }
 0x2de   :  { %1616 = vmatprep.subr.bf16.mxu1 %v1825_v0 }
 0x2e1   :  { %1617 = vmatpush3.bf16.msra.mxu1 %v1724_v26 }
 0x2e2   :  { %1634 = vmatprep.subr.bf16.mxu1 %v1825_v0 }
 0x394   :  { %v432_v39 = vpop.f32.mrf.mxu1 }
 0x395   :  { %v433_v40 = vadd.f32 %v1436_v38, %v432_v39 }
 0x396   :  { %v1590_v41 = vpop.f32.mrf.mxu1 }
 0x397   :  { %v438_v42 = vpack.c.bf16 %v433_v40, %v433_v40  ;;  %1398 = vrot.lane.b32.xlu1 %v433_v40, %s1828_s1 }
 0x398   :  { %v435_v43 = vpop.f32.mrf.mxu1 }
 0x399   :  { %1595 = vmatmul.mubr.msk.bf16.vlgmr.msra.gmra.mxu0 %vm452_vm5, %v438_v42 }
 0x39a   :  { %v1591_v44 = vpop.f32.mrf.mxu1  ;;  %1606 = vmatprep.mubr.msk.bf16.mxu0 %vm1827_vm2, %v1825_v0  ;;  %1599 = vmatpush3.bf16.msra.mxu0 %v1717_v45 }
 0x39b   :  { %1600 = vmatprep.subr.bf16.mxu0 %v1825_v0 }
 0x39e   :  { %1601 = vmatpush3.bf16.msra.mxu0 %v1718_v46 }
 0x39f   :  { %1602 = vmatprep.subr.bf16.mxu0 %v1825_v0 }
 0x3a2   :  { %1603 = vmatpush3.bf16.msra.mxu0 %v1719_v47 }
 0x3a3   :  { %1604 = vmatprep.subr.bf16.mxu0 %v1825_v0 }
 0x3a6   :  { %1605 = vmatpush3.bf16.msra.mxu0 %v1720_v48 }
 0x3a7   :  { %1622 = vmatprep.subr.bf16.mxu0 %v1825_v0 }
 0x459   :  { %v490_v50 = vpop.f32.mrf.mxu0 }
 0x45a   :  { %v491_v51 = vadd.f32 %v1442_v49, %v490_v50 }
 0x45b   :  { %v1596_v52 = vpop.f32.mrf.mxu0 }
 0x45c   :  { %v496_v53 = vmax.f32 %v491_v51, 0.0 }
 0x45d   :  { %v493_v54 = vpop.f32.mrf.mxu0 }
 0x45e   :  { %v497_v55 = vsel %vm122_vm4, %v496_v53, 0.0  ;;  %v504_v56 = vmul.f32 %v496_v53, %v496_v53 }
 0x45f   :  { %v498_v57 = vrot.slane %v497_v55, 4  ;;  %v1597_v58 = vpop.f32.mrf.mxu0 }
 0x460   :  { %v505_v59 = vsel %vm122_vm4, %v504_v56, 0.0  ;;  %v1453_v58 = vld [vmem:[#allocation6 + $0xc] ss:$0 sm:$0xff] }
 0x461   :  { %v499_v60 = vadd.f32 %v498_v57, %v497_v55  ;;  %v506_v61 = vrot.slane %v505_v59, 4 }
 0x463   :  { %v500_v62 = vrot.slane %v499_v60, 2  ;;  %v507_v63 = vadd.f32 %v506_v61, %v505_v59  ;;  %v815_v61 = vld [vmem:[#allocation4 + $0xd4] sm:$0x3] }
 0x465   :  { %v501_v1 = vadd.f32 %v500_v62, %v499_v60  ;;  %v508_v2 = vrot.slane %v507_v63, 2  ;;  %v1454_v60 = vld [vmem:[#allocation6 + $0xd] ss:$0 sm:$0xff] }
 0x467   :  { %v502_v4 = vrot.slane %v501_v1, 1  ;;  %v509_v5 = vadd.f32 %v508_v2, %v507_v63 }
 0x469   :  { %v503_v6 = vadd.f32 %v502_v4, %v501_v1  ;;  %v510_v8 = vrot.slane %v509_v5, 1  ;;  %v817_v1 = vand.u32 %v815_v61, %v1877_v3  ;;  %v1725_v4 = vld [vmem:[#allocation4 + $0xcc] sm:$0xff]  }
 0x46b   :  { %v511_v9 = vadd.f32 %v510_v8, %v509_v5  ;;  %v512_v10 = vmul.f32 0.125, %v503_v6  ;;  %v60_v5 = vld [vmem:[%s1991_s0] sm:$0xff]  ;;  %s1829_s0 = smov 48  }
 0x46c   :  { %v812_v6 = vpack.c.bf16 %v60_v5, %v60_v5  ;;  %v1728_v8 = vld [vmem:[#allocation4 + $0xb4] sm:$0xff]  }
 0x46d   :  { %v513_v11 = vmul.f32 0.125, %v511_v9  ;;  %v514_v12 = vmul.f32 %v512_v10, %v512_v10  ;;  %v516_v15 = vsub.f32 %v496_v53, %v512_v10  ;;  %v1729_v9 = vld [vmem:[#allocation4 + $0xac] sm:$0xff]  }
 0x46e   :  { %v1455_v10 = vld [vmem:[#allocation6 + $0xe] ss:$0 sm:$0xff] }
 0x46f   :  { %v515_v13 = vsub.f32 %v513_v11, %v514_v12 }
 0x471   :  { %v517_v14 = vadd.f32 1e-05, %v515_v13 }
 0x473   :  { %1742 = vrsqrt.f32 %v517_v14 }
 0x480   :  { %v1743_v16 = vpop.eup %1742 }
 0x481   :  { %v519_v18 = vmul.f32 %v1743_v16, %v516_v15  ;;  %v1730_v16 = vld [vmem:[#allocation4 + $0xe0] sm:$0xff]  }
 0x483   :  { %v525_v20 = vmul.f32 %v1445_v17, %v519_v18 }
 0x485   :  { %v531_v21 = vadd.f32 %v1446_v19, %v525_v20  ;;  %v1731_v20 = vld [vmem:[#allocation4 + $0xd8] sm:$0xff]  }
 0x487   :  { %v532_v22 = vpack.c.bf16 %v531_v21, %v531_v21 }
 0x489   :  { %1607 = vmatmul.mubr.msk.bf16.vlgmr.msra.gmra.mxu0 %vm122_vm4, %v532_v22 }
 0x48a   :  { %1630 = vmatprep.mubr.msk.bf16.mxu0 %vm1827_vm2, %v1825_v0  ;;  %1623 = vmatpush3.bf16.msra.mxu0 %v1726_v27 }
 0x48b   :  { %1624 = vmatprep.subr.bf16.mxu0 %v1825_v0 }
 0x48e   :  { %1625 = vmatpush3.bf16.msra.mxu0 %v1727_v28 }
 0x48f   :  { %1626 = vmatprep.subr.bf16.mxu0 %v1825_v0 }
 0x492   :  { %1627 = vmatpush3.bf16.msra.mxu0 %v1728_v8 }
 0x493   :  { %1628 = vmatprep.subr.bf16.mxu0 %v1825_v0 }
 0x496   :  { %1629 = vmatpush3.bf16.msra.mxu0 %v1729_v9 }
 0x497   :  { %1646 = vmatprep.subr.bf16.mxu0 %v1825_v0 }
 0x549   :  { %v607_v30 = vpop.f32.mrf.mxu0 }
 0x54a   :  { %v608_v31 = vadd.f32 %v1447_v29, %v607_v30 }
 0x54b   :  { %v1608_v32 = vpop.f32.mrf.mxu0 }
 0x54c   :  { %v613_v33 = vmax.f32 %v608_v31, 0.0 }
 0x54d   :  { %v610_v34 = vpop.f32.mrf.mxu0 }
 0x54e   :  { %v614_v35 = vsel %vm122_vm4, %v613_v33, 0.0  ;;  %v621_v36 = vmul.f32 %v613_v33, %v613_v33 }
 0x54f   :  { %v615_v37 = vrot.slane %v614_v35, 4  ;;  %v1609_v38 = vpop.f32.mrf.mxu0 }
 0x550   :  { %v622_v39 = vsel %vm122_vm4, %v621_v36, 0.0 }
 0x551   :  { %v616_v40 = vadd.f32 %v615_v37, %v614_v35  ;;  %v623_v41 = vrot.slane %v622_v39, 4 }
 0x553   :  { %v617_v42 = vrot.slane %v616_v40, 2  ;;  %v624_v43 = vadd.f32 %v623_v41, %v622_v39 }
 0x555   :  { %v618_v44 = vadd.f32 %v617_v42, %v616_v40  ;;  %v625_v45 = vrot.slane %v624_v43, 2 }
 0x557   :  { %v619_v46 = vrot.slane %v618_v44, 1  ;;  %v626_v47 = vadd.f32 %v625_v45, %v624_v43 }
 0x559   :  { %v620_v48 = vadd.f32 %v619_v46, %v618_v44  ;;  %v627_v49 = vrot.slane %v626_v47, 1 }
 0x55b   :  { %v628_v50 = vadd.f32 %v627_v49, %v626_v47  ;;  %v629_v51 = vmul.f32 0.125, %v620_v48 }
 0x55d   :  { %v630_v52 = vmul.f32 0.125, %v628_v50  ;;  %v631_v53 = vmul.f32 %v629_v51, %v629_v51  ;;  %v633_v56 = vsub.f32 %v613_v33, %v629_v51 }
 0x55f   :  { %v632_v54 = vsub.f32 %v630_v52, %v631_v53 }
 0x561   :  { %v634_v55 = vadd.f32 1e-05, %v632_v54  ;;  %v1471_v54 = vld [vmem:[#allocation6 + $0x11] ss:$0 sm:$0xff] }
 0x563   :  { %1744 = vrsqrt.f32 %v634_v55 }
 0x570   :  { %v1745_v57 = vpop.eup %1744 }
 0x571   :  { %v636_v59 = vmul.f32 %v1745_v57, %v633_v56  ;;  %v1472_v56 = vld [vmem:[#allocation6 + $0x12] ss:$0 sm:$0xff]  ;;  %v1093_v57 = vld [vmem:[#allocation4 + $0xfc] sm:$0x3] }
 0x573   :  { %v642_v62 = vmul.f32 %v1453_v58, %v636_v59 }
 0x575   :  { %v648_v63 = vadd.f32 %v1454_v60, %v642_v62  ;;  %v1095_v60 = vand.u32 %v1093_v57, %v1877_v3  ;;  %v1732_v62 = vld [vmem:[#allocation4 + $0xf0] sm:$0xff]   ;;  %v1733_v3 = vld [vmem:[#allocation4 + $0xe8] sm:$0xff]  }
 0x577   :  { %v649_v2 = vpack.c.bf16 %v648_v63, %v648_v63  ;;  %v1461_v63 = vld [vmem:[#allocation6 + $0xf] ss:$0 sm:$0xff] }
 0x579   :  { %1619 = vmatmul.mubr.msk.bf16.vlgmr.msra.gmra.mxu1 %vm122_vm4, %v649_v2 }
 0x57a   :  { %1635 = vmatpush3.bf16.msra.mxu1 %v817_v1  ;;  %1636 = vmatprep.mubr.msk.bf16.mxu1 %vm1827_vm2, %v1825_v0 }
 0x57b   :  { %1640 = vmatprep.subr.bf16.mxu1 %v1825_v0 }
 0x581   :  { %1637 = vmatmul.mubr.msk.bf16.vlgmr.msra.gmra.mxu1 %vm70_vm3, %v1883_v7 }
 0x582   :  { %1641 = vmatpush3.bf16.msra.mxu1 %v1725_v4  ;;  %1642 = vmatprep.mubr.msk.bf16.mxu1 %vm1827_vm2, %v1825_v0 }
 0x583   :  { %1654 = vmatprep.subr.bf16.mxu1 %v1825_v0 }
 0x589   :  { %1643 = vmatmul.mubr.msk.bf16.vlgmr.msra.gmra.mxu1 %vm452_vm5, %v812_v6 }
 0x58a   :  { %1658 = vmatprep.mubr.msk.bf16.mxu1 %vm1827_vm2, %v1825_v0  ;;  %1655 = vmatpush3.bf16.msra.mxu1 %v1732_v62 }
 0x58b   :  { %1656 = vmatprep.subr.bf16.mxu1 %v1825_v0 }
 0x58e   :  { %1657 = vmatpush3.bf16.msra.mxu1 %v1733_v3 }
 0x58f   :  { %1668 = vmatprep.subr.bf16.mxu1 %v1825_v0 }
 0x639   :  { %v724_v11 = vpop.f32.mrf.mxu1 }
 0x63a   :  { %v725_v12 = vadd.f32 %v1455_v10, %v724_v11 }
 0x63b   :  { %v1620_v13 = vpop.f32.mrf.mxu1 }
 0x63c   :  { %v730_v14 = vmax.f32 %v725_v12, 0.0 }
 0x63d   :  { %v727_v15 = vpop.f32.mrf.mxu1 }
 0x63e   :  { %v731_v17 = vpack.c.bf16 %v730_v14, %v730_v14  ;;  %v1092_v15 = vld [vmem:[#allocation4 + $0xf8] sm:$0xf] }
 0x63f   :  { %v1621_v18 = vpop.f32.mrf.mxu1 }
 0x640   :  { %1631 = vmatmul.mubr.msk.bf16.vlgmr.msra.gmra.mxu0 %vm122_vm4, %v731_v17  ;;  %v1477_v17 = vld [vmem:[#allocation6 + $0x14] ss:$0 sm:$0xff] }
 0x641   :  { %v853_v19 = vpop.f32.mrf.mxu1  ;;  %1647 = vmatpush3.bf16.msra.mxu0 %v1730_v16  ;;  %1650 = vmatprep.mubr.msk.bf16.mxu0 %vm1827_vm2, %v1825_v0  ;;  %v1143_v16 = vsel %vm1141_vm7, %v1092_v15, 0 }
 0x642   :  { %1648 = vmatprep.subr.bf16.mxu0 %v1825_v0 }
 0x643   :  { %v1638_v21 = vpop.f32.mrf.mxu1 }
 0x645   :  { %v856_v22 = vpop.f32.mrf.mxu1  ;;  %1649 = vmatpush3.bf16.msra.mxu0 %v1731_v20 }
 0x646   :  { %1662 = vmatprep.subr.bf16.mxu0 %v1825_v0 }
 0x647   :  { %v1639_v23 = vpop.f32.mrf.mxu1 }
 0x649   :  { %v902_v24 = vpop.f32.mrf.mxu1 }
 0x64a   :  { %v903_v26 = vadd.f32 %v902_v24, %v853_v19 }
 0x64b   :  { %v1644_v27 = vpop.f32.mrf.mxu1 }
 0x64c   :  { %v913_v28 = vadd.f32 %v1470_v25, %v903_v26 }
 0x64d   :  { %v905_v29 = vpop.f32.mrf.mxu1 }
 0x64e   :  { %v914_v30 = vmax.f32 %v913_v28, 0.0 }
 0x64f   :  { %v1645_v31 = vpop.f32.mrf.mxu1 }
 0x650   :  { %v916_v32 = vsel %vm915_vm6, %v914_v30, 0.0  ;;  %v923_v33 = vmul.f32 %v914_v30, %v914_v30 }
 0x651   :  { %v917_v34 = vrot.slane %v916_v32, 4 }
 0x652   :  { %v924_v35 = vsel %vm915_vm6, %v923_v33, 0.0 }
 0x653   :  { %v918_v36 = vadd.f32 %v917_v34, %v916_v32  ;;  %v925_v37 = vrot.slane %v924_v35, 4 }
 0x655   :  { %v919_v38 = vrot.slane %v918_v36, 2  ;;  %v926_v39 = vadd.f32 %v925_v37, %v924_v35  ;;  %v1734_v35 = vld [vmem:[#allocation4 + $0x108] sm:$0xff]  }
 0x657   :  { %v920_v40 = vadd.f32 %v919_v38, %v918_v36  ;;  %v927_v41 = vrot.slane %v926_v39, 2  ;;  %v1735_v36 = vld [vmem:[#allocation4 + $0x100] sm:$0xff]   ;;  %v1483_v38 = vld [vmem:[#allocation6 + $0x15] ss:$0 sm:$0xff] }
 0x659   :  { %v921_v42 = vrot.slane %v920_v40, 1  ;;  %v928_v43 = vadd.f32 %v927_v41, %v926_v39 }
 0x65b   :  { %v922_v44 = vadd.f32 %v921_v42, %v920_v40  ;;  %v929_v45 = vrot.slane %v928_v43, 1 }
 0x65d   :  { %v930_v46 = vadd.f32 %v929_v45, %v928_v43  ;;  %v931_v47 = vmul.f32 0.125, %v922_v44 }
 0x65f   :  { %v932_v48 = vmul.f32 0.125, %v930_v46  ;;  %v933_v49 = vmul.f32 %v931_v47, %v931_v47  ;;  %v935_v52 = vsub.f32 %v914_v30, %v931_v47  ;;  %v62_v30 = vld [vmem:[#allocation2] sm:$0xff] }
 0x661   :  { %v934_v50 = vsub.f32 %v932_v48, %v933_v49 }
 0x663   :  { %v936_v51 = vadd.f32 1e-05, %v934_v50 }
 0x665   :  { %1746 = vrsqrt.f32 %v936_v51 }
 0x672   :  { %v1747_v53 = vpop.eup %1746 }
 0x673   :  { %v938_v55 = vmul.f32 %v1747_v53, %v935_v52 }
 0x675   :  { %v944_v58 = vmul.f32 %v1471_v54, %v938_v55 }
 0x677   :  { %v950_v59 = vadd.f32 %v1472_v56, %v944_v58 }
 0x679   :  { %v951_v61 = vpack.c.bf16 %v950_v59, %v950_v59 }
 0x67b   :  { %1651 = vmatmul.mubr.msk.bf16.vlgmr.msra.gmra.mxu0 %vm915_vm6, %v951_v61 }
 0x67c   :  { %1663 = vmatpush3.bf16.msra.mxu0 %v1095_v60  ;;  %1664 = vmatprep.mubr.msk.bf16.mxu0 %vm1827_vm2, %v1825_v0 }
 0x67d   :  { %1674 = vmatprep.subr.bf16.mxu0 %v1825_v0 }
 0x683   :  { %1665 = vmatmul.mubr.msk.bf16.vlgmr.msra.gmra.mxu0 %vm70_vm3, %v1883_v7  ;;  %v1473_v7 = vld [vmem:[#allocation6 + $0x13] ss:$0 sm:$0xff] }
 0x684   :  { %1678 = vmatprep.mubr.msk.bf16.mxu0 %vm1827_vm2, %v1825_v0  ;;  %1675 = vmatpush3.bf16.msra.mxu0 %v1734_v35 }
 0x685   :  { %1676 = vmatprep.subr.bf16.mxu0 %v1825_v0 }
 0x688   :  { %1677 = vmatpush3.bf16.msra.mxu0 %v1735_v36 }
 0x700   :  { %v806_v1 = vpop.f32.mrf.mxu0 }
 0x701   :  { %v807_v2 = vadd.f32 %v1461_v63, %v806_v1 }
 0x702   :  { %v1632_v4 = vpop.f32.mrf.mxu0 }
 0x703   :  { %1402 = vrot.lane.b32.xlu1 %v807_v2, %s1829_s0  ;;  %v1484_v4 = vld [vmem:[#allocation6 + $0x16] ss:$0 sm:$0xff] }
 0x704   :  { %v809_v5 = vpop.f32.mrf.mxu0 }
 0x706   :  { %v1633_v6 = vpop.f32.mrf.mxu0 }
 0x707   :  { %v1485_v6 = vld [vmem:[#allocation6 + $0x17] ss:$0 sm:$0xff] }
 0x73b   :  { %v1010_v8 = vpop.f32.mrf.mxu0 }
 0x73c   :  { %v1011_v9 = vadd.f32 %v1473_v7, %v1010_v8 }
 0x73d   :  { %v1652_v10 = vpop.f32.mrf.mxu0 }
 0x73e   :  { %v1016_v11 = vmax.f32 %v1011_v9, 0.0  ;;  %v1736_v10 = vld [vmem:[#allocation4 + $0x118] sm:$0xff]  }
 0x73f   :  { %v1013_v12 = vpop.f32.mrf.mxu0 }
 0x740   :  { %v1017_v13 = vpack.c.bf16 %v1016_v11, %v1016_v11  ;;  %v1737_v11 = vld [vmem:[#allocation4 + $0x110] sm:$0xff]   ;;  %v1486_v12 = vld [vmem:[#allocation6 + $0x18] ss:$0 sm:$0xff] }
 0x741   :  { %v1653_v14 = vpop.f32.mrf.mxu0 }
 0x742   :  { %1659 = vmatmul.mubr.msk.bf16.vlgmr.msra.gmra.mxu1 %vm915_vm6, %v1017_v13 }
 0x743   :  { %1670 = vmatprep.mubr.msk.bf16.mxu1 %vm1827_vm2, %v1825_v0  ;;  %1669 = vmatpush3.bf16.msra.mxu1 %v1143_v16  ;;  %v1131_v25 = vpop.f32.mrf.mxu0 }
 0x744   :  { %1682 = vmatprep.subr.bf16.mxu1 %v1825_v0 }
 0x745   :  { %v1666_v26 = vpop.f32.mrf.mxu0 }
 0x747   :  { %v1134_v27 = vpop.f32.mrf.mxu0 }
 0x749   :  { %v1667_v29 = vpop.f32.mrf.mxu0 }
 0x802   :  { %v1076_v18 = vpop.f32.mrf.mxu1 }
 0x803   :  { %v1077_v19 = vadd.f32 %v1477_v17, %v1076_v18 }
 0x804   :  { %v1660_v20 = vpop.f32.mrf.mxu1 }
 0x805   :  { %v1082_v21 = vmul.f32 0.5, %v1077_v19 }
 0x806   :  { %v1079_v22 = vpop.f32.mrf.mxu1 }
 0x807   :  { %v1083_v23 = vmul.f32 1.442695, %v1082_v21 }
 0x808   :  { %v1661_v24 = vpop.f32.mrf.mxu1 }
 0x809   :  { %1748 = vpow2.f32 %v1083_v23 }
 0x816   :  { %v1749_v28 = vpop.eup %1748 }
 0x817   :  { %1086 = vrot.lane.b32.xlu0 %v1749_v28, %s1830_s13 }
 0x81b   :  { %1394 = vrot.lane.b32.xlu0 %v1077_v19, %s1831_s14 }
 0x889   :  { %v1087_v31 = vpop.permute.xlu0 %1086 }
 0x88a   :  { %v1089_v32 = vmul.f32 %v1087_v31, %v62_v30 }
 0x88c   :  { %v1090_v33 = vadd.f32 %v1089_v32, %v1077_v19 }
 0x88e   :  { %v1091_v34 = vpack.c.bf16 %v1090_v33, %v1090_v33 }
 0x890   :  { %1671 = vmatmul.mubr.msk.bf16.vlgmr.msra.gmra.mxu1 %vm1137_vm8, %v1091_v34 }
 0x891   :  { %1686 = vmatprep.mubr.msk.bf16.mxu1 %vm1827_vm2, %v1825_v0  ;;  %1683 = vmatpush3.bf16.msra.mxu1 %v1736_v10 }
 0x892   :  { %1684 = vmatprep.subr.bf16.mxu1 %v1825_v0 }
 0x895   :  { %1685 = vmatpush3.bf16.msra.mxu1 %v1737_v11 }
 0x950   :  { %v1179_v37 = vpop.f32.mrf.mxu1 }
 0x951   :  { %v1180_v39 = vadd.f32 %v1179_v37, %v1131_v25 }
 0x952   :  { %v1672_v40 = vpop.f32.mrf.mxu1 }
 0x953   :  { %v1190_v41 = vadd.f32 %v1483_v38, %v1180_v39  ;;  %v1490_v40 = vld [vmem:[#allocation6 + $0x19] ss:$0 sm:$0xff] }
 0x954   :  { %v1182_v42 = vpop.f32.mrf.mxu1 }
 0x955   :  { %v1191_v43 = vmax.f32 %v1190_v41, 0.0  ;;  %v1491_v42 = vld [vmem:[#allocation6 + $0x1a] ss:$0 sm:$0xff] }
 0x956   :  { %v1673_v44 = vpop.f32.mrf.mxu1 }
 0x957   :  { %v1192_v45 = vsel %vm915_vm6, %v1191_v43, 0.0  ;;  %v1199_v46 = vmul.f32 %v1191_v43, %v1191_v43 }
 0x958   :  { %v1193_v47 = vrot.slane %v1192_v45, 4 }
 0x959   :  { %v1200_v48 = vsel %vm915_vm6, %v1199_v46, 0.0  ;;  %v1492_v46 = vld [vmem:[#allocation6 + $0x1b] ss:$0 sm:$0xff] }
 0x95a   :  { %v1194_v49 = vadd.f32 %v1193_v47, %v1192_v45  ;;  %v1201_v50 = vrot.slane %v1200_v48, 4  ;;  %v1399_v47 = vpop.permute.xlu1 %1398 }
 0x95c   :  { %v1195_v51 = vrot.slane %v1194_v49, 2  ;;  %v1202_v52 = vadd.f32 %v1201_v50, %v1200_v48  ;;  %v1395_v50 = vpop.permute.xlu0 %1394 }
 0x95e   :  { %v1196_v53 = vadd.f32 %v1195_v51, %v1194_v49  ;;  %v1203_v54 = vrot.slane %v1202_v52, 2 }
 0x960   :  { %v1197_v55 = vrot.slane %v1196_v53, 1  ;;  %v1204_v56 = vadd.f32 %v1203_v54, %v1202_v52 }
 0x962   :  { %v1198_v57 = vadd.f32 %v1197_v55, %v1196_v53  ;;  %v1205_v58 = vrot.slane %v1204_v56, 1  ;;  %v1403_v53 = vpop.permute.xlu1 %1402 }
 0x964   :  { %v1206_v59 = vadd.f32 %v1205_v58, %v1204_v56  ;;  %v1207_v60 = vmul.f32 0.125, %v1198_v57 }
 0x966   :  { %v1208_v61 = vmul.f32 0.125, %v1206_v59  ;;  %v1209_v62 = vmul.f32 %v1207_v60, %v1207_v60  ;;  %v1211_v1 = vsub.f32 %v1191_v43, %v1207_v60 }
 0x968   :  { %v1210_v3 = vsub.f32 %v1208_v61, %v1209_v62 }
 0x96a   :  { %v1212_v63 = vadd.f32 1e-05, %v1210_v3 }
 0x96c   :  { %1750 = vrsqrt.f32 %v1212_v63 }
 0x979   :  { %v1751_v2 = vpop.eup %1750 }
 0x97a   :  { %v1214_v5 = vmul.f32 %v1751_v2, %v1211_v1 }
 0x97c   :  { %v1220_v7 = vmul.f32 %v1484_v4, %v1214_v5 }
 0x97e   :  { %v1226_v8 = vadd.f32 %v1485_v6, %v1220_v7 }
 0x980   :  { %v1227_v9 = vpack.c.bf16 %v1226_v8, %v1226_v8 }
 0x982   :  { %1679 = vmatmul.mubr.msk.bf16.vlgmr.msra.gmra.mxu0 %vm915_vm6, %v1227_v9 }
 0xa42   :  { %v1286_v13 = vpop.f32.mrf.mxu0 }
 0xa43   :  { %v1287_v14 = vadd.f32 %v1486_v12, %v1286_v13 }
 0xa44   :  { %v1680_v15 = vpop.f32.mrf.mxu0 }
 0xa45   :  { %v1292_v16 = vmax.f32 %v1287_v14, 0.0 }
 0xa46   :  { %v1289_v17 = vpop.f32.mrf.mxu0 }
 0xa47   :  { %v1293_v18 = vsel %vm915_vm6, %v1292_v16, 0.0  ;;  %v1300_v19 = vmul.f32 %v1292_v16, %v1292_v16 }
 0xa48   :  { %v1294_v20 = vrot.slane %v1293_v18, 4  ;;  %v1681_v21 = vpop.f32.mrf.mxu0 }
 0xa49   :  { %v1301_v22 = vsel %vm915_vm6, %v1300_v19, 0.0 }
 0xa4a   :  { %v1295_v23 = vadd.f32 %v1294_v20, %v1293_v18  ;;  %v1302_v24 = vrot.slane %v1301_v22, 4 }
 0xa4c   :  { %v1296_v25 = vrot.slane %v1295_v23, 2  ;;  %v1303_v26 = vadd.f32 %v1302_v24, %v1301_v22 }
 0xa4e   :  { %v1297_v0 = vadd.f32 %v1296_v25, %v1295_v23  ;;  %v1304_v27 = vrot.slane %v1303_v26, 2 }
 0xa50   :  { %v1298_v28 = vrot.slane %v1297_v0, 1  ;;  %v1305_v29 = vadd.f32 %v1304_v27, %v1303_v26 }
 0xa52   :  { %v1299_v30 = vadd.f32 %v1298_v28, %v1297_v0  ;;  %v1306_v31 = vrot.slane %v1305_v29, 1 }
 0xa54   :  { %v1307_v32 = vadd.f32 %v1306_v31, %v1305_v29  ;;  %v1308_v33 = vmul.f32 0.125, %v1299_v30 }
 0xa56   :  { %v1309_v34 = vmul.f32 0.125, %v1307_v32  ;;  %v1310_v35 = vmul.f32 %v1308_v33, %v1308_v33  ;;  %v1312_v38 = vsub.f32 %v1292_v16, %v1308_v33 }
 0xa58   :  { %v1311_v36 = vsub.f32 %v1309_v34, %v1310_v35 }
 0xa5a   :  { %v1313_v37 = vadd.f32 1e-05, %v1311_v36 }
 0xa5c   :  { %1752 = vrsqrt.f32 %v1313_v37 }
 0xa69   :  { %v1753_v39 = vpop.eup %1752 }
 0xa6a   :  { %v1315_v41 = vmul.f32 %v1753_v39, %v1312_v38 }
 0xa6c   :  { %v1321_v43 = vmul.f32 %v1490_v40, %v1315_v41 }
 0xa6e   :  { %v1327_v44 = vadd.f32 %v1491_v42, %v1321_v43 }
 0xa70   :  { %v1328_v45 = vpack.c.bf16 %v1327_v44, %v1327_v44 }
 0xa72   :  { %1687 = vmatmul.mubr.msk.bf16.vlgmr.msra.gmra.mxu1 %vm915_vm6, %v1328_v45 }
 0xb32   :  { %v1387_v48 = vpop.f32.mrf.mxu1 }
 0xb33   :  { %v1388_v49 = vadd.f32 %v1492_v46, %v1387_v48 }
 0xb34   :  { %v1688_v51 = vpop.f32.mrf.mxu1 }
 0xb35   :  { %v1405_v52 = vsel %vm452_vm5, %v1388_v49, %v1395_v50 }
 0xb36   :  { %v1406_v54 = vsel %vm915_vm6, %v1405_v52, %v1399_v47  ;;  %v1390_v55 = vpop.f32.mrf.mxu1 }
 0xb37   :  { %v1408_v56 = vsel %vm1407_vm9, %v1406_v54, %v1403_v53 }
 0xb38   :  { %v1410_v57 = vsel %vm1409_vm10, %v1408_v56, 0.0  ;;  %v1689_v58 = vpop.f32.mrf.mxu1 }
 0xb39   :  { %1411 = vst [vmem:[%s1996_s5] sm:$0xff] %v1410_v57 }
 0xb3a   :  { %1416 = vsyncpa [#allocation3], 1 }
 0xb3b   :  { %1417 = vsyncpa [#allocation5], 1 }

</bundles_post_ra>
